<compile_context>
chip_gen: v7x
topology: tpu7x:2x2x1
jax: 0.10.0
libtpu: 0.0.40
codegen_flags: <defaults>
</compile_context>

<pallas_src>
from functools import partial

import jax
import jax.numpy as jnp
from jax.experimental import pallas as pl
from jax.experimental.pallas import tpu as pltpu


def _vmem_limit_bytes():
    cap = 128 * 1024 * 1024
    try:
        info = pltpu.get_tpu_info()
        cap = int(getattr(info, "vmem_capacity_bytes", cap))
    except Exception:
        pass
    # leave ~25% headroom for Mosaic internal scratch / double buffering;
    # never request more than 96 MiB even on 128 MiB parts.
    return int(min(cap * 3 // 4, 96 * 1024 * 1024))


_VMEM_LIMIT = _vmem_limit_bytes()


def _pick_tile(n, target, align, max_full_block=8192):
    """Largest multiple of `align` that divides n and is <= target.

    Falls back to the full dimension only when it stays a sanely-sized single
    block; otherwise raise instead of silently creating a giant block."""
    if n <= target:
        return n
    t = (min(n, target) // align) * align
    while t >= align:
        if n % t == 0:
            return t
        t -= align
    if n <= max_full_block:
        return n
    raise ValueError(f"no {align}-aligned tile <= {target} divides {n}; pad the input")


def _gelu_exact(x):
    # exact GELU (PyTorch nn.GELU default, approximate='none')
    return 0.5 * x * (1.0 + jax.lax.erf(x * 0.7071067811865476))


# --------------------- fused LayerNorm -> Linear (-> GELU) -------------------
def _ln_linear_kernel(x_ref, g_ref, b_ref, w_ref, bias_ref, o_ref, xln_ref,
                      *, eps, activation):
    # LayerNorm computed once per row tile (at the first output tile) and
    # cached in a bf16 VMEM scratch, reused for all output tiles j > 0.
    @pl.when(pl.program_id(1) == 0)
    def _ln():
        x = x_ref[...].astype(jnp.float32)
        mu = jnp.mean(x, axis=-1, keepdims=True)
        xc = x - mu
        var = jnp.mean(xc * xc, axis=-1, keepdims=True)
        xn = xc * jax.lax.rsqrt(var + eps) * g_ref[...] + b_ref[...]
        xln_ref[...] = xn.astype(jnp.bfloat16)

    acc = jnp.dot(xln_ref[...], w_ref[...], preferred_element_type=jnp.float32)
    acc = acc + bias_ref[...]
    if activation == "gelu":
        acc = _gelu_exact(acc)
    o_ref[...] = acc.astype(o_ref.dtype)


def ln_linear(x2d, gamma, beta, w, b, *, activation="none", out_dtype=None,
              eps=1e-5, tm=256, tn=512):
    M, K = x2d.shape
    Kw, Nout = w.shape
    assert K == Kw
    out_dtype = out_dtype or x2d.dtype
    tm = _pick_tile(M, tm, 16)
    tn = _pick_tile(Nout, tn, 128)
    grid = (M // tm, Nout // tn)
    return pl.pallas_call(
        partial(_ln_linear_kernel, eps=eps, activation=activation),
        out_shape=jax.ShapeDtypeStruct((M, Nout), out_dtype),
        grid=grid,
        in_specs=[
            pl.BlockSpec((tm, K), lambda i, j: (i, 0)),
            pl.BlockSpec((1, K), lambda i, j: (0, 0)),
            pl.BlockSpec((1, K), lambda i, j: (0, 0)),
            pl.BlockSpec((K, tn), lambda i, j: (0, j)),
            pl.BlockSpec((1, tn), lambda i, j: (0, j)),
        ],
        out_specs=pl.BlockSpec((tm, tn), lambda i, j: (i, j)),
        scratch_shapes=[pltpu.VMEM((tm, K), jnp.bfloat16)],   # cached LN(x)
        compiler_params=pltpu.CompilerParams(
            # j must be 'arbitrary' so the LN cache is always written at j==0.
            dimension_semantics=("parallel", "arbitrary"),
            vmem_limit_bytes=_VMEM_LIMIT),
    )(x2d, gamma.reshape(1, K).astype(jnp.float32),
      beta.reshape(1, K).astype(jnp.float32),
      w.astype(jnp.bfloat16), b.reshape(1, Nout).astype(jnp.float32))


# ------------- K-tiled Linear + bias + residual-add epilogue -----------------
def _linear_add_kernel(x_ref, w_ref, bias_ref, res_ref, o_ref, acc_ref):
    k = pl.program_id(2)

    @pl.when(k == 0)
    def _init():
        acc_ref[...] = jnp.zeros_like(acc_ref)

    acc_ref[...] += jnp.dot(x_ref[...].astype(jnp.bfloat16), w_ref[...],
                            preferred_element_type=jnp.float32)

    @pl.when(k == pl.num_programs(2) - 1)
    def _finish():
        o_ref[...] = (acc_ref[...] + bias_ref[...]
                      + res_ref[...].astype(jnp.float32)).astype(o_ref.dtype)


def linear_add(x2d, w, b, residual, *, tm=256, tn=512, tk=512):
    M, K = x2d.shape
    Kw, Nout = w.shape
    assert K == Kw and residual.shape == (M, Nout)
    tm = _pick_tile(M, tm, 16)
    tn = _pick_tile(Nout, tn, 128)
    tk = _pick_tile(K, tk, 128)
    grid = (M // tm, Nout // tn, K // tk)
    return pl.pallas_call(
        _linear_add_kernel,
        out_shape=jax.ShapeDtypeStruct((M, Nout), residual.dtype),
        grid=grid,
        in_specs=[
            pl.BlockSpec((tm, tk), lambda i, j, k: (i, k)),
            pl.BlockSpec((tk, tn), lambda i, j, k: (k, j)),
            pl.BlockSpec((1, tn), lambda i, j, k: (0, j)),
            pl.BlockSpec((tm, tn), lambda i, j, k: (i, j)),
        ],
        out_specs=pl.BlockSpec((tm, tn), lambda i, j, k: (i, j)),
        scratch_shapes=[pltpu.VMEM((tm, tn), jnp.float32)],
        compiler_params=pltpu.CompilerParams(
            dimension_semantics=("parallel", "parallel", "arbitrary"),
            vmem_limit_bytes=_VMEM_LIMIT),
    )(x2d, w.astype(jnp.bfloat16),
      b.reshape(1, Nout).astype(jnp.float32), residual)


# ------------------- LION selective attention (KV-blocked) -------------------
def _lion_attn_kernel(q_ref, k_ref, v_ref, lor_ref, hir_ref, loc_ref, hic_ref,
                      o_ref, acc_ref, den_ref, *, tq, tkv):
    qi = pl.program_id(1)
    ki = pl.program_id(2)

    @pl.when(ki == 0)
    def _init():
        acc_ref[...] = jnp.zeros_like(acc_ref)
        den_ref[...] = jnp.zeros_like(den_ref)

    q = q_ref[0]               # (H, tq, D)  bf16: SiLU+0.5, L2-normed, *scale
    k = k_ref[0]               # (H, tkv, D) bf16: SiLU+0.5, L2-normed
    v = v_ref[0]               # (H, tkv, D) bf16

    # scores for all heads at once (batched over the head axis on the MXU)
    s = jax.lax.dot_general(q, k, (((2,), (2,)), ((0,), (0,))),
                            preferred_element_type=jnp.float32)  # (H, tq, tkv)

    # Causal_Mask_Selective: log M[i,j] = cs[i]-cs[j] (j<=i) else cs[j+1]-cs[i+1]
    lo_r = lor_ref[0]          # (H, tq)  cs[i]
    hi_r = hir_ref[0]          # (H, tq)  cs[i+1]
    lo_c = loc_ref[0]          # (H, tkv) cs[j]
    hi_c = hic_ref[0]          # (H, tkv) cs[j+1]
    row = qi * tq + jax.lax.broadcasted_iota(jnp.int32, (tq, tkv), 0)
    col = ki * tkv + jax.lax.broadcasted_iota(jnp.int32, (tq, tkv), 1)
    lower = (col <= row)[None, :, :]
    log_m = jnp.where(lower,
                      lo_r[:, :, None] - lo_c[:, None, :],
                      hi_c[:, None, :] - hi_r[:, :, None])
    # cs is non-increasing, so log_m <= 0 and exp never overflows in f32.
    p = s * jnp.exp(log_m)                                       # (H, tq, tkv)

    den_ref[...] += jnp.sum(p, axis=-1)                          # (H, tq)
    acc_ref[...] += jax.lax.dot_general(p.astype(jnp.bfloat16), v,
                                        (((2,), (1,)), ((0,), (0,))),
                                        preferred_element_type=jnp.float32)

    @pl.when(ki == pl.num_programs(2) - 1)
    def _finish():
        out = acc_ref[...] / (den_ref[...][:, :, None] + 1e-6)
        o_ref[...] = out[None].astype(o_ref.dtype)


def lion_attention_core(q_n, k_n, v, gates_lo, gates_hi, *, tq=256, tkv=512):
    B, H, N, D = q_n.shape
    tq = _pick_tile(N, tq, 16)
    tkv = _pick_tile(N, tkv, 16)
    grid = (B, N // tq, N // tkv)
    kern = partial(_lion_attn_kernel, tq=tq, tkv=tkv)
    return pl.pallas_call(
        kern,
        out_shape=jax.ShapeDtypeStruct((B, H, N, D), jnp.bfloat16),
        grid=grid,
        in_specs=[
            pl.BlockSpec((1, H, tq, D), lambda b, i, j: (b, 0, i, 0)),   # q
            pl.BlockSpec((1, H, tkv, D), lambda b, i, j: (b, 0, j, 0)),  # k
            pl.BlockSpec((1, H, tkv, D), lambda b, i, j: (b, 0, j, 0)),  # v
            pl.BlockSpec((1, H, tq), lambda b, i, j: (b, 0, i)),         # cs[i]
            pl.BlockSpec((1, H, tq), lambda b, i, j: (b, 0, i)),         # cs[i+1]
            pl.BlockSpec((1, H, tkv), lambda b, i, j: (b, 0, j)),        # cs[j]
            pl.BlockSpec((1, H, tkv), lambda b, i, j: (b, 0, j)),        # cs[j+1]
        ],
        out_specs=pl.BlockSpec((1, H, tq, D), lambda b, i, j: (b, 0, i, 0)),
        scratch_shapes=[
            pltpu.VMEM((H, tq, D), jnp.float32),   # numerator accumulator
            pltpu.VMEM((H, tq), jnp.float32),      # row-sum denominator
        ],
        compiler_params=pltpu.CompilerParams(
            dimension_semantics=("parallel", "parallel", "arbitrary"),
            vmem_limit_bytes=_VMEM_LIMIT),
    )(q_n, k_n, v, gates_lo, gates_hi, gates_lo, gates_hi)


# -------------------------------- Lion_Block ---------------------------------
def _silu_shifted_normed(t):
    # silu_shifted from the reference: SiLU(x)+0.5, L2-normalised over the
    # per-head feature dim (last axis).
    s = t * jax.nn.sigmoid(t) + 0.5
    return s * jax.lax.rsqrt(jnp.sum(s * s, axis=-1, keepdims=True))


def fuse_gate_projection(qkv_w, qkv_b, ai_w, ai_b):
    """Concatenate the tiny gate projection onto qkv along the output dim,
    padding the gate columns up to a full 128-lane group."""
    C = qkv_w.shape[0]
    H = ai_w.shape[1]
    hp = ((H + 127) // 128) * 128
    w = jnp.concatenate([qkv_w, ai_w, jnp.zeros((C, hp - H), qkv_w.dtype)], axis=1)
    b = jnp.concatenate([qkv_b, ai_b, jnp.zeros((hp - H,), qkv_b.dtype)], axis=0)
    return w, b


def lion_block(x, params, num_heads):
    B, N, C = x.shape
    H = num_heads
    D = C // H
    scale = float(D) ** (-0.5)
    x2 = x.reshape(B * N, C)

    # ---- attention branch: fused LayerNorm -> [qkv | gate] projection ----
    fused = ln_linear(x2, params["ln1_g"], params["ln1_b"],
                      params["qkvg_w"], params["qkvg_b"],
                      out_dtype=jnp.float32)                    # (B*N, 3C+Hpad)

    def heads(t2d):   # (B*N, C) -> (B, H, N, D)
        return t2d.reshape(B, N, H, D).transpose(0, 2, 1, 3)

    q = heads(fused[:, 0 * C:1 * C])
    k = heads(fused[:, 1 * C:2 * C])
    v = heads(fused[:, 2 * C:3 * C]).astype(jnp.bfloat16)
    # q/k nonlinearity + per-head L2 normalisation hoisted out of the attention
    # kernel (computed once instead of once per tile); scale folded into q.
    q_n = (_silu_shifted_normed(q) * scale).astype(jnp.bfloat16)
    k_n = _silu_shifted_normed(k).astype(jnp.bfloat16)

    # selective gates: a[0]=1, a[t]=1-sigmoid(Linear(LN(x)))[t]; cumulative
    # log-sums feed the decay mask (tiny O(B*H*N) work, plain JAX).
    logits = fused[:, 3 * C:3 * C + H].reshape(B, N, H).transpose(0, 2, 1)
    a = 1.0 - jax.nn.sigmoid(logits)
    a = jnp.concatenate([jnp.ones_like(a[..., :1]), a[..., 1:]], axis=-1)
    a = jnp.maximum(a, 1e-20)                                   # guard log(0)
    cs = jnp.concatenate(
        [jnp.zeros_like(a[..., :1]), jnp.cumsum(jnp.log(a), axis=-1)], axis=-1)
    gates_lo = cs[..., :N]      # cs[n]
    gates_hi = cs[..., 1:]      # cs[n+1]

    attn = lion_attention_core(q_n, k_n, v, gates_lo, gates_hi)  # (B, H, N, D)
    attn2 = attn.transpose(0, 2, 1, 3).reshape(B * N, C)
    x2 = linear_add(attn2, params["proj_w"], params["proj_b"], x2)  # + residual

    # ---- MLP branch: LayerNorm fused into fc1, residual fused into fc2 ----
    h = ln_linear(x2, params["ln2_g"], params["ln2_b"],
                  params["fc1_w"], params["fc1_b"],
                  activation="gelu", out_dtype=jnp.bfloat16)
    x2 = linear_add(h, params["fc2_w"], params["fc2_b"], x2)
    return x2.reshape(B, N, C)


def init_params(key, dim, num_heads, mlp_ratio=4.0):
    hidden = int(dim * mlp_ratio)
    ks = jax.random.split(key, 5)
    s = 0.02
    f32 = jnp.float32
    # weights stored as (in, out); qkv_bias=False -> zero bias
    qkv_w = s * jax.random.normal(ks[0], (dim, 3 * dim), f32)
    qkv_b = jnp.zeros((3 * dim,), f32)
    ai_w = s * jax.random.normal(ks[1], (dim, num_heads), f32)
    ai_b = jnp.zeros((num_heads,), f32)
    qkvg_w, qkvg_b = fuse_gate_projection(qkv_w, qkv_b, ai_w, ai_b)
    return {
        "ln1_g": jnp.ones((dim,), f32),
        "ln1_b": jnp.zeros((dim,), f32),
        "ln2_g": jnp.ones((dim,), f32),
        "ln2_b": jnp.zeros((dim,), f32),
        "qkvg_w": qkvg_w,
        "qkvg_b": qkvg_b,
        "proj_w": s * jax.random.normal(ks[2], (dim, dim), f32),
        "proj_b": jnp.zeros((dim,), f32),
        "fc1_w": s * jax.random.normal(ks[3], (dim, hidden), f32),
        "fc1_b": jnp.zeros((hidden,), f32),
        "fc2_w": s * jax.random.normal(ks[4], (hidden, dim), f32),
        "fc2_b": jnp.zeros((dim,), f32),
    }


if __name__ == "__main__":
    B, N, dim, num_heads = 2, 8, 32, 4   # seq=8 tokens, C=32, D=8 per head

    key = jax.random.PRNGKey(0)
    kx, kp = jax.random.split(key)
    x = jax.random.normal(kx, (B, N, dim), jnp.float32)
    params = init_params(kp, dim, num_heads)

    fwd = jax.jit(partial(lion_block, num_heads=num_heads))
    y = fwd(x, params)
    jax.block_until_ready(y)
    assert y.shape == (B, N, dim)
    assert bool(jnp.all(jnp.isfinite(y)))
    print("KERNEL_OK")
</pallas_src>

<mosaic_0001>
module attributes {stable_mosaic.version = 11 : i64} {
  func.func @_ln_linear_kernel(%arg0: i32, %arg1: i32, %arg2: memref<16x32xf32, #tpu.memory_space<vmem>>, %arg3: memref<1x32xf32, #tpu.memory_space<vmem>>, %arg4: memref<1x32xf32, #tpu.memory_space<vmem>>, %arg5: memref<32x224xbf16, #tpu.memory_space<vmem>>, %arg6: memref<1x224xf32, #tpu.memory_space<vmem>>, %arg7: memref<16x224xf32, #tpu.memory_space<vmem>>, %arg8: memref<16x32xbf16, #tpu.memory_space<vmem>>) attributes {dimension_semantics = [#tpu.dimension_semantics<parallel>, #tpu.dimension_semantics<arbitrary>], iteration_bounds = array<i64: 1, 1>, scalar_prefetch = 0 : i64, scratch_operands = 1 : i64, tpu.core_type = #tpu.core_type<tc>, window_params = [{transform_indices = @transform_0, window_bounds = array<i64: 16, 32>}, {pipeline_mode = #tpu.pipeline_mode<synchronous>, transform_indices = @transform_1, window_bounds = array<i64: 1, 32>}, {pipeline_mode = #tpu.pipeline_mode<synchronous>, transform_indices = @transform_2, window_bounds = array<i64: 1, 32>}, {transform_indices = @transform_3, window_bounds = array<i64: 32, 224>}, {transform_indices = @transform_4, window_bounds = array<i64: 1, 224>}, {transform_indices = @transform_5, window_bounds = array<i64: 16, 224>}]} {
    %c0_i32 = arith.constant 0 : i32
    %0 = arith.cmpi eq, %arg1, %c0_i32 : i32
    %1 = arith.extui %0 : i1 to i32
    %c0_i32_0 = arith.constant 0 : i32
    %2 = arith.cmpi ne, %1, %c0_i32_0 : i32
    scf.if %2 {
      %c0_8 = arith.constant 0 : index
      %c0_9 = arith.constant 0 : index
      %10 = vector.load %arg2[%c0_8, %c0_9] : memref<16x32xf32, #tpu.memory_space<vmem>>, vector<16x32xf32>
      %cst_10 = arith.constant dense<0.000000e+00> : vector<16xf32>
      %11 = vector.multi_reduction <add>, %10, %cst_10 [1] : vector<16x32xf32> to vector<16xf32>
      %12 = vector.shape_cast %11 : vector<16xf32> to vector<16x1xf32>
      %cst_11 = arith.constant 3.200000e+01 : f32
      %13 = vector.broadcast %cst_11 : f32 to vector<16x1xf32>
      %14 = arith.divf %12, %13 : vector<16x1xf32>
      %15 = vector.broadcast %14 : vector<16x1xf32> to vector<16x32xf32>
      %16 = arith.subf %10, %15 : vector<16x32xf32>
      %17 = arith.mulf %16, %16 : vector<16x32xf32>
      %cst_12 = arith.constant dense<0.000000e+00> : vector<16xf32>
      %18 = vector.multi_reduction <add>, %17, %cst_12 [1] : vector<16x32xf32> to vector<16xf32>
      %19 = vector.shape_cast %18 : vector<16xf32> to vector<16x1xf32>
      %cst_13 = arith.constant 3.200000e+01 : f32
      %20 = vector.broadcast %cst_13 : f32 to vector<16x1xf32>
      %21 = arith.divf %19, %20 : vector<16x1xf32>
      %cst_14 = arith.constant 9.99999974E-6 : f32
      %22 = vector.broadcast %cst_14 : f32 to vector<16x1xf32>
      %23 = arith.addf %21, %22 : vector<16x1xf32>
      %24 = math.rsqrt %23 : vector<16x1xf32>
      %25 = vector.broadcast %24 : vector<16x1xf32> to vector<16x32xf32>
      %26 = arith.mulf %16, %25 : vector<16x32xf32>
      %c0_15 = arith.constant 0 : index
      %c0_16 = arith.constant 0 : index
      %27 = vector.load %arg3[%c0_15, %c0_16] : memref<1x32xf32, #tpu.memory_space<vmem>>, vector<1x32xf32>
      %28 = vector.broadcast %27 : vector<1x32xf32> to vector<16x32xf32>
      %29 = arith.mulf %26, %28 : vector<16x32xf32>
      %c0_17 = arith.constant 0 : index
      %c0_18 = arith.constant 0 : index
      %30 = vector.load %arg4[%c0_17, %c0_18] : memref<1x32xf32, #tpu.memory_space<vmem>>, vector<1x32xf32>
      %31 = vector.broadcast %30 : vector<1x32xf32> to vector<16x32xf32>
      %32 = arith.addf %29, %31 : vector<16x32xf32>
      %33 = arith.truncf %32 : vector<16x32xf32> to vector<16x32xbf16>
      %c0_19 = arith.constant 0 : index
      %c0_20 = arith.constant 0 : index
      %34 = vector.load %arg8[%c0_19, %c0_20] : memref<16x32xbf16, #tpu.memory_space<vmem>>, vector<16x32xbf16>
      tpu.vector_store %arg8[%c0_19, %c0_20], %33 {strides = array<i32>} : memref<16x32xbf16, #tpu.memory_space<vmem>>, vector<16x32xbf16>,
    } else {
    }
    %c0 = arith.constant 0 : index
    %c0_1 = arith.constant 0 : index
    %3 = vector.load %arg8[%c0, %c0_1] : memref<16x32xbf16, #tpu.memory_space<vmem>>, vector<16x32xbf16>
    %c0_2 = arith.constant 0 : index
    %c0_3 = arith.constant 0 : index
    %4 = vector.load %arg5[%c0_2, %c0_3] : memref<32x224xbf16, #tpu.memory_space<vmem>>, vector<32x224xbf16>
    %cst = arith.constant dense<0.000000e+00> : vector<16x224xf32>
    %5 = tpu.matmul %3, %4, %cst {dimension_numbers = #tpu.dot_dimension_numbers<[1], [0], [0], [1], [0, 0, 1, 1], [], []>} : vector<16x32xbf16>, vector<32x224xbf16>, vector<16x224xf32> -> vector<16x224xf32>
    %c0_4 = arith.constant 0 : index
    %c0_5 = arith.constant 0 : index
    %6 = vector.load %arg6[%c0_4, %c0_5] : memref<1x224xf32, #tpu.memory_space<vmem>>, vector<1x224xf32>
    %7 = vector.broadcast %6 : vector<1x224xf32> to vector<16x224xf32>
    %8 = arith.addf %5, %7 : vector<16x224xf32>
    %c0_6 = arith.constant 0 : index
    %c0_7 = arith.constant 0 : index
    %9 = vector.load %arg7[%c0_6, %c0_7] : memref<16x224xf32, #tpu.memory_space<vmem>>, vector<16x224xf32>
    tpu.vector_store %arg7[%c0_6, %c0_7], %8 {strides = array<i32>} : memref<16x224xf32, #tpu.memory_space<vmem>>, vector<16x224xf32>,
    return
  }
  func.func @transform_0(%arg0: i32, %arg1: i32) -> (i32, i32) {
    %c0_i32 = arith.constant 0 : i32
    %c0_i32_0 = arith.constant 0 : i32
    return %arg0, %c0_i32 : i32, i32
  }
  func.func @transform_1(%arg0: i32, %arg1: i32) -> (i32, i32) {
    %c0_i32 = arith.constant 0 : i32
    %c0_i32_0 = arith.constant 0 : i32
    %c0_i32_1 = arith.constant 0 : i32
    return %c0_i32, %c0_i32_0 : i32, i32
  }
  func.func @transform_2(%arg0: i32, %arg1: i32) -> (i32, i32) {
    %c0_i32 = arith.constant 0 : i32
    %c0_i32_0 = arith.constant 0 : i32
    %c0_i32_1 = arith.constant 0 : i32
    return %c0_i32, %c0_i32_0 : i32, i32
  }
  func.func @transform_3(%arg0: i32, %arg1: i32) -> (i32, i32) {
    %c0_i32 = arith.constant 0 : i32
    %c0_i32_0 = arith.constant 0 : i32
    return %c0_i32, %arg1 : i32, i32
  }
  func.func @transform_4(%arg0: i32, %arg1: i32) -> (i32, i32) {
    %c0_i32 = arith.constant 0 : i32
    %c0_i32_0 = arith.constant 0 : i32
    return %c0_i32, %arg1 : i32, i32
  }
  func.func @transform_5(%arg0: i32, %arg1: i32) -> (i32, i32) {
    %c0_i32 = arith.constant 0 : i32
    return %arg0, %arg1 : i32, i32
  }
}

module attributes {stable_mosaic.version = 11 : i64} {
  func.func @_lion_attn_kernel(%arg0: i32, %arg1: i32, %arg2: i32, %arg3: memref<1x4x8x8xbf16, #tpu.memory_space<vmem>>, %arg4: memref<1x4x8x8xbf16, #tpu.memory_space<vmem>>, %arg5: memref<1x4x8x8xbf16, #tpu.memory_space<vmem>>, %arg6: memref<1x4x8xf32, #tpu.memory_space<vmem>>, %arg7: memref<1x4x8xf32, #tpu.memory_space<vmem>>, %arg8: memref<1x4x8xf32, #tpu.memory_space<vmem>>, %arg9: memref<1x4x8xf32, #tpu.memory_space<vmem>>, %arg10: memref<1x4x8x8xbf16, #tpu.memory_space<vmem>>, %arg11: memref<4x8x8xf32, #tpu.memory_space<vmem>>, %arg12: memref<4x8xf32, #tpu.memory_space<vmem>>) attributes {dimension_semantics = [#tpu.dimension_semantics<parallel>, #tpu.dimension_semantics<parallel>, #tpu.dimension_semantics<arbitrary>], iteration_bounds = array<i64: 2, 1, 1>, scalar_prefetch = 0 : i64, scratch_operands = 2 : i64, tpu.core_type = #tpu.core_type<tc>, window_params = [{transform_indices = @transform_0, window_bounds = array<i64: 1, 4, 8, 8>}, {transform_indices = @transform_1, window_bounds = array<i64: 1, 4, 8, 8>}, {transform_indices = @transform_2, window_bounds = array<i64: 1, 4, 8, 8>}, {transform_indices = @transform_3, window_bounds = array<i64: 1, 4, 8>}, {transform_indices = @transform_4, window_bounds = array<i64: 1, 4, 8>}, {transform_indices = @transform_5, window_bounds = array<i64: 1, 4, 8>}, {transform_indices = @transform_6, window_bounds = array<i64: 1, 4, 8>}, {transform_indices = @transform_7, window_bounds = array<i64: 1, 4, 8, 8>}]} {
    %c0_i32 = arith.constant 0 : i32
    %0 = arith.cmpi eq, %arg2, %c0_i32 : i32
    %1 = arith.extui %0 : i1 to i32
    %c0_i32_0 = arith.constant 0 : i32
    %2 = arith.cmpi ne, %1, %c0_i32_0 : i32
    scf.if %2 {
      %cst_39 = arith.constant 0.000000e+00 : f32
      %55 = vector.broadcast %cst_39 : f32 to vector<4x8x8xf32>
      %c0_40 = arith.constant 0 : index
      %c0_41 = arith.constant 0 : index
      %c0_42 = arith.constant 0 : index
      %56 = vector.load %arg11[%c0_40, %c0_41, %c0_42] : memref<4x8x8xf32, #tpu.memory_space<vmem>>, vector<4x8x8xf32>
      tpu.vector_store %arg11[%c0_40, %c0_41, %c0_42], %55 {strides = array<i32>} : memref<4x8x8xf32, #tpu.memory_space<vmem>>, vector<4x8x8xf32>,
      %cst_43 = arith.constant 0.000000e+00 : f32
      %57 = vector.broadcast %cst_43 : f32 to vector<4x8xf32>
      %c0_44 = arith.constant 0 : index
      %c0_45 = arith.constant 0 : index
      %58 = vector.load %arg12[%c0_44, %c0_45] : memref<4x8xf32, #tpu.memory_space<vmem>>, vector<4x8xf32>
      tpu.vector_store %arg12[%c0_44, %c0_45], %57 {strides = array<i32>} : memref<4x8xf32, #tpu.memory_space<vmem>>, vector<4x8xf32>,
    } else {
    }
    %c0 = arith.constant 0 : index
    %c0_1 = arith.constant 0 : index
    %c0_2 = arith.constant 0 : index
    %c0_3 = arith.constant 0 : index
    %3 = vector.load %arg3[%c0, %c0_1, %c0_2, %c0_3] : memref<1x4x8x8xbf16, #tpu.memory_space<vmem>>, vector<1x4x8x8xbf16>
    %4 = vector.shape_cast %3 : vector<1x4x8x8xbf16> to vector<4x8x8xbf16>
    %c0_4 = arith.constant 0 : index
    %c0_5 = arith.constant 0 : index
    %c0_6 = arith.constant 0 : index
    %c0_7 = arith.constant 0 : index
    %5 = vector.load %arg4[%c0_4, %c0_5, %c0_6, %c0_7] : memref<1x4x8x8xbf16, #tpu.memory_space<vmem>>, vector<1x4x8x8xbf16>
    %6 = vector.shape_cast %5 : vector<1x4x8x8xbf16> to vector<4x8x8xbf16>
    %c0_8 = arith.constant 0 : index
    %c0_9 = arith.constant 0 : index
    %c0_10 = arith.constant 0 : index
    %c0_11 = arith.constant 0 : index
    %7 = vector.load %arg5[%c0_8, %c0_9, %c0_10, %c0_11] : memref<1x4x8x8xbf16, #tpu.memory_space<vmem>>, vector<1x4x8x8xbf16>
    %8 = vector.shape_cast %7 : vector<1x4x8x8xbf16> to vector<4x8x8xbf16>
    %cst = arith.constant dense<0.000000e+00> : vector<4x8x8xf32>
    %9 = tpu.matmul %4, %6, %cst {dimension_numbers = #tpu.dot_dimension_numbers<[2], [2], [1], [1], [0, 0, 0, 1, 1, 1], [0], [0]>} : vector<4x8x8xbf16>, vector<4x8x8xbf16>, vector<4x8x8xf32> -> vector<4x8x8xf32>
    %c0_12 = arith.constant 0 : index
    %c0_13 = arith.constant 0 : index
    %c0_14 = arith.constant 0 : index
    %10 = vector.load %arg6[%c0_12, %c0_13, %c0_14] : memref<1x4x8xf32, #tpu.memory_space<vmem>>, vector<1x4x8xf32>
    %11 = vector.shape_cast %10 : vector<1x4x8xf32> to vector<4x8xf32>
    %c0_15 = arith.constant 0 : index
    %c0_16 = arith.constant 0 : index
    %c0_17 = arith.constant 0 : index
    %12 = vector.load %arg7[%c0_15, %c0_16, %c0_17] : memref<1x4x8xf32, #tpu.memory_space<vmem>>, vector<1x4x8xf32>
    %13 = vector.shape_cast %12 : vector<1x4x8xf32> to vector<4x8xf32>
    %c0_18 = arith.constant 0 : index
    %c0_19 = arith.constant 0 : index
    %c0_20 = arith.constant 0 : index
    %14 = vector.load %arg8[%c0_18, %c0_19, %c0_20] : memref<1x4x8xf32, #tpu.memory_space<vmem>>, vector<1x4x8xf32>
    %15 = vector.shape_cast %14 : vector<1x4x8xf32> to vector<4x8xf32>
    %c0_21 = arith.constant 0 : index
    %c0_22 = arith.constant 0 : index
    %c0_23 = arith.constant 0 : index
    %16 = vector.load %arg9[%c0_21, %c0_22, %c0_23] : memref<1x4x8xf32, #tpu.memory_space<vmem>>, vector<1x4x8xf32>
    %17 = vector.shape_cast %16 : vector<1x4x8xf32> to vector<4x8xf32>
    %c8_i32 = arith.constant 8 : i32
    %18 = arith.muli %arg1, %c8_i32 : i32
    %19 = tpu.iota {dimensions = array<i32: 0>} : vector<8x8xi32>
    %20 = vector.broadcast %18 : i32 to vector<8x8xi32>
    %21 = arith.addi %20, %19 : vector<8x8xi32>
    %c8_i32_24 = arith.constant 8 : i32
    %22 = arith.muli %arg2, %c8_i32_24 : i32
    %23 = tpu.iota {dimensions = array<i32: 1>} : vector<8x8xi32>
    %24 = vector.broadcast %22 : i32 to vector<8x8xi32>
    %25 = arith.addi %24, %23 : vector<8x8xi32>
    %26 = arith.cmpi sle, %25, %21 : vector<8x8xi32>
    %27 = vector.shape_cast %26 : vector<8x8xi1> to vector<1x8x8xi1>
    %28 = vector.shape_cast %11 : vector<4x8xf32> to vector<4x8x1xf32>
    %29 = vector.shape_cast %15 : vector<4x8xf32> to vector<4x1x8xf32>
    %30 = vector.broadcast %28 : vector<4x8x1xf32> to vector<4x8x8xf32>
    %31 = vector.broadcast %29 : vector<4x1x8xf32> to vector<4x8x8xf32>
    %32 = arith.subf %30, %31 : vector<4x8x8xf32>
    %33 = vector.shape_cast %17 : vector<4x8xf32> to vector<4x1x8xf32>
    %34 = vector.shape_cast %13 : vector<4x8xf32> to vector<4x8x1xf32>
    %35 = vector.broadcast %33 : vector<4x1x8xf32> to vector<4x8x8xf32>
    %36 = vector.broadcast %34 : vector<4x8x1xf32> to vector<4x8x8xf32>
    %37 = arith.subf %35, %36 : vector<4x8x8xf32>
    %38 = vector.shape_cast %27 : vector<1x8x8xi1> to vector<1x8x8xi1>
    %39 = vector.broadcast %38 : vector<1x8x8xi1> to vector<4x8x8xi1>
    %40 = arith.select %39, %32, %37 : vector<4x8x8xi1>, vector<4x8x8xf32>
    %41 = math.exp %40 : vector<4x8x8xf32>
    %42 = arith.mulf %9, %41 : vector<4x8x8xf32>
    %c0_25 = arith.constant 0 : index
    %c0_26 = arith.constant 0 : index
    %43 = vector.load %arg12[%c0_25, %c0_26] : memref<4x8xf32, #tpu.memory_space<vmem>>, vector<4x8xf32>
    %cst_27 = arith.constant dense<0.000000e+00> : vector<4x8xf32>
    %44 = vector.multi_reduction <add>, %42, %cst_27 [2] : vector<4x8x8xf32> to vector<4x8xf32>
    %45 = arith.addf %43, %44 : vector<4x8xf32>
    %c0_28 = arith.constant 0 : index
    %c0_29 = arith.constant 0 : index
    %46 = vector.load %arg12[%c0_28, %c0_29] : memref<4x8xf32, #tpu.memory_space<vmem>>, vector<4x8xf32>
    tpu.vector_store %arg12[%c0_28, %c0_29], %45 {strides = array<i32>} : memref<4x8xf32, #tpu.memory_space<vmem>>, vector<4x8xf32>,
    %c0_30 = arith.constant 0 : index
    %c0_31 = arith.constant 0 : index
    %c0_32 = arith.constant 0 : index
    %47 = vector.load %arg11[%c0_30, %c0_31, %c0_32] : memref<4x8x8xf32, #tpu.memory_space<vmem>>, vector<4x8x8xf32>
    %48 = arith.truncf %42 : vector<4x8x8xf32> to vector<4x8x8xbf16>
    %cst_33 = arith.constant dense<0.000000e+00> : vector<4x8x8xf32>
    %49 = tpu.matmul %48, %8, %cst_33 {dimension_numbers = #tpu.dot_dimension_numbers<[2], [1], [1], [2], [0, 0, 0, 1, 1, 2], [0], [0]>} : vector<4x8x8xbf16>, vector<4x8x8xbf16>, vector<4x8x8xf32> -> vector<4x8x8xf32>
    %50 = arith.addf %47, %49 : vector<4x8x8xf32>
    %c0_34 = arith.constant 0 : index
    %c0_35 = arith.constant 0 : index
    %c0_36 = arith.constant 0 : index
    %51 = vector.load %arg11[%c0_34, %c0_35, %c0_36] : memref<4x8x8xf32, #tpu.memory_space<vmem>>, vector<4x8x8xf32>
    tpu.vector_store %arg11[%c0_34, %c0_35, %c0_36], %50 {strides = array<i32>} : memref<4x8x8xf32, #tpu.memory_space<vmem>>, vector<4x8x8xf32>,
    %c0_i32_37 = arith.constant 0 : i32
    %52 = arith.cmpi eq, %arg2, %c0_i32_37 : i32
    %53 = arith.extui %52 : i1 to i32
    %c0_i32_38 = arith.constant 0 : i32
    %54 = arith.cmpi ne, %53, %c0_i32_38 : i32
    scf.if %54 {
      %c0_39 = arith.constant 0 : index
      %c0_40 = arith.constant 0 : index
      %c0_41 = arith.constant 0 : index
      %55 = vector.load %arg11[%c0_39, %c0_40, %c0_41] : memref<4x8x8xf32, #tpu.memory_space<vmem>>, vector<4x8x8xf32>
      %c0_42 = arith.constant 0 : index
      %c0_43 = arith.constant 0 : index
      %56 = vector.load %arg12[%c0_42, %c0_43] : memref<4x8xf32, #tpu.memory_space<vmem>>, vector<4x8xf32>
      %57 = vector.shape_cast %56 : vector<4x8xf32> to vector<4x8x1xf32>
      %cst_44 = arith.constant 9.99999997E-7 : f32
      %58 = vector.broadcast %cst_44 : f32 to vector<4x8x1xf32>
      %59 = arith.addf %57, %58 : vector<4x8x1xf32>
      %60 = vector.broadcast %59 : vector<4x8x1xf32> to vector<4x8x8xf32>
      %61 = arith.divf %55, %60 : vector<4x8x8xf32>
      %62 = vector.shape_cast %61 : vector<4x8x8xf32> to vector<1x4x8x8xf32>
      %63 = arith.truncf %62 : vector<1x4x8x8xf32> to vector<1x4x8x8xbf16>
      %c0_45 = arith.constant 0 : index
      %c0_46 = arith.constant 0 : index
      %c0_47 = arith.constant 0 : index
      %c0_48 = arith.constant 0 : index
      %64 = vector.load %arg10[%c0_45, %c0_46, %c0_47, %c0_48] : memref<1x4x8x8xbf16, #tpu.memory_space<vmem>>, vector<1x4x8x8xbf16>
      tpu.vector_store %arg10[%c0_45, %c0_46, %c0_47, %c0_48], %63 {strides = array<i32>} : memref<1x4x8x8xbf16, #tpu.memory_space<vmem>>, vector<1x4x8x8xbf16>,
    } else {
    }
    return
  }
  func.func @transform_0(%arg0: i32, %arg1: i32, %arg2: i32) -> (i32, i32, i32, i32) {
    %c0_i32 = arith.constant 0 : i32
    %c0_i32_0 = arith.constant 0 : i32
    %c0_i32_1 = arith.constant 0 : i32
    return %arg0, %c0_i32, %arg1, %c0_i32_0 : i32, i32, i32, i32
  }
  func.func @transform_1(%arg0: i32, %arg1: i32, %arg2: i32) -> (i32, i32, i32, i32) {
    %c0_i32 = arith.constant 0 : i32
    %c0_i32_0 = arith.constant 0 : i32
    %c0_i32_1 = arith.constant 0 : i32
    return %arg0, %c0_i32, %arg2, %c0_i32_0 : i32, i32, i32, i32
  }
  func.func @transform_2(%arg0: i32, %arg1: i32, %arg2: i32) -> (i32, i32, i32, i32) {
    %c0_i32 = arith.constant 0 : i32
    %c0_i32_0 = arith.constant 0 : i32
    %c0_i32_1 = arith.constant 0 : i32
    return %arg0, %c0_i32, %arg2, %c0_i32_0 : i32, i32, i32, i32
  }
  func.func @transform_3(%arg0: i32, %arg1: i32, %arg2: i32) -> (i32, i32, i32) {
    %c0_i32 = arith.constant 0 : i32
    %c0_i32_0 = arith.constant 0 : i32
    return %arg0, %c0_i32, %arg1 : i32, i32, i32
  }
  func.func @transform_4(%arg0: i32, %arg1: i32, %arg2: i32) -> (i32, i32, i32) {
    %c0_i32 = arith.constant 0 : i32
    %c0_i32_0 = arith.constant 0 : i32
    return %arg0, %c0_i32, %arg1 : i32, i32, i32
  }
  func.func @transform_5(%arg0: i32, %arg1: i32, %arg2: i32) -> (i32, i32, i32) {
    %c0_i32 = arith.constant 0 : i32
    %c0_i32_0 = arith.constant 0 : i32
    return %arg0, %c0_i32, %arg2 : i32, i32, i32
  }
  func.func @transform_6(%arg0: i32, %arg1: i32, %arg2: i32) -> (i32, i32, i32) {
    %c0_i32 = arith.constant 0 : i32
    %c0_i32_0 = arith.constant 0 : i32
    return %arg0, %c0_i32, %arg2 : i32, i32, i32
  }
  func.func @transform_7(%arg0: i32, %arg1: i32, %arg2: i32) -> (i32, i32, i32, i32) {
    %c0_i32 = arith.constant 0 : i32
    %c0_i32_0 = arith.constant 0 : i32
    %c0_i32_1 = arith.constant 0 : i32
    return %arg0, %c0_i32, %arg1, %c0_i32_0 : i32, i32, i32, i32
  }
}

module attributes {stable_mosaic.version = 11 : i64} {
  func.func @_linear_add_kernel(%arg0: i32, %arg1: i32, %arg2: i32, %arg3: memref<16x32xbf16, #tpu.memory_space<vmem>>, %arg4: memref<32x32xbf16, #tpu.memory_space<vmem>>, %arg5: memref<1x32xf32, #tpu.memory_space<vmem>>, %arg6: memref<16x32xf32, #tpu.memory_space<vmem>>, %arg7: memref<16x32xf32, #tpu.memory_space<vmem>>, %arg8: memref<16x32xf32, #tpu.memory_space<vmem>>) attributes {dimension_semantics = [#tpu.dimension_semantics<parallel>, #tpu.dimension_semantics<parallel>, #tpu.dimension_semantics<arbitrary>], iteration_bounds = array<i64: 1, 1, 1>, scalar_prefetch = 0 : i64, scratch_operands = 1 : i64, tpu.core_type = #tpu.core_type<tc>, window_params = [{transform_indices = @transform_0, window_bounds = array<i64: 16, 32>}, {transform_indices = @transform_1, window_bounds = array<i64: 32, 32>}, {transform_indices = @transform_2, window_bounds = array<i64: 1, 32>}, {transform_indices = @transform_3, window_bounds = array<i64: 16, 32>}, {transform_indices = @transform_4, window_bounds = array<i64: 16, 32>}]} {
    %c0_i32 = arith.constant 0 : i32
    %0 = arith.cmpi eq, %arg2, %c0_i32 : i32
    %1 = arith.extui %0 : i1 to i32
    %c0_i32_0 = arith.constant 0 : i32
    %2 = arith.cmpi ne, %1, %c0_i32_0 : i32
    scf.if %2 {
      %cst_10 = arith.constant 0.000000e+00 : f32
      %12 = vector.broadcast %cst_10 : f32 to vector<16x32xf32>
      %c0_11 = arith.constant 0 : index
      %c0_12 = arith.constant 0 : index
      %13 = vector.load %arg8[%c0_11, %c0_12] : memref<16x32xf32, #tpu.memory_space<vmem>>, vector<16x32xf32>
      tpu.vector_store %arg8[%c0_11, %c0_12], %12 {strides = array<i32>} : memref<16x32xf32, #tpu.memory_space<vmem>>, vector<16x32xf32>,
    } else {
    }
    %c0 = arith.constant 0 : index
    %c0_1 = arith.constant 0 : index
    %3 = vector.load %arg8[%c0, %c0_1] : memref<16x32xf32, #tpu.memory_space<vmem>>, vector<16x32xf32>
    %c0_2 = arith.constant 0 : index
    %c0_3 = arith.constant 0 : index
    %4 = vector.load %arg3[%c0_2, %c0_3] : memref<16x32xbf16, #tpu.memory_space<vmem>>, vector<16x32xbf16>
    %c0_4 = arith.constant 0 : index
    %c0_5 = arith.constant 0 : index
    %5 = vector.load %arg4[%c0_4, %c0_5] : memref<32x32xbf16, #tpu.memory_space<vmem>>, vector<32x32xbf16>
    %cst = arith.constant dense<0.000000e+00> : vector<16x32xf32>
    %6 = tpu.matmul %4, %5, %cst {dimension_numbers = #tpu.dot_dimension_numbers<[1], [0], [0], [1], [0, 0, 1, 1], [], []>} : vector<16x32xbf16>, vector<32x32xbf16>, vector<16x32xf32> -> vector<16x32xf32>
    %7 = arith.addf %3, %6 : vector<16x32xf32>
    %c0_6 = arith.constant 0 : index
    %c0_7 = arith.constant 0 : index
    %8 = vector.load %arg8[%c0_6, %c0_7] : memref<16x32xf32, #tpu.memory_space<vmem>>, vector<16x32xf32>
    tpu.vector_store %arg8[%c0_6, %c0_7], %7 {strides = array<i32>} : memref<16x32xf32, #tpu.memory_space<vmem>>, vector<16x32xf32>,
    %c0_i32_8 = arith.constant 0 : i32
    %9 = arith.cmpi eq, %arg2, %c0_i32_8 : i32
    %10 = arith.extui %9 : i1 to i32
    %c0_i32_9 = arith.constant 0 : i32
    %11 = arith.cmpi ne, %10, %c0_i32_9 : i32
    scf.if %11 {
      %c0_10 = arith.constant 0 : index
      %c0_11 = arith.constant 0 : index
      %12 = vector.load %arg8[%c0_10, %c0_11] : memref<16x32xf32, #tpu.memory_space<vmem>>, vector<16x32xf32>
      %c0_12 = arith.constant 0 : index
      %c0_13 = arith.constant 0 : index
      %13 = vector.load %arg5[%c0_12, %c0_13] : memref<1x32xf32, #tpu.memory_space<vmem>>, vector<1x32xf32>
      %14 = vector.broadcast %13 : vector<1x32xf32> to vector<16x32xf32>
      %15 = arith.addf %12, %14 : vector<16x32xf32>
      %c0_14 = arith.constant 0 : index
      %c0_15 = arith.constant 0 : index
      %16 = vector.load %arg6[%c0_14, %c0_15] : memref<16x32xf32, #tpu.memory_space<vmem>>, vector<16x32xf32>
      %17 = arith.addf %15, %16 : vector<16x32xf32>
      %c0_16 = arith.constant 0 : index
      %c0_17 = arith.constant 0 : index
      %18 = vector.load %arg7[%c0_16, %c0_17] : memref<16x32xf32, #tpu.memory_space<vmem>>, vector<16x32xf32>
      tpu.vector_store %arg7[%c0_16, %c0_17], %17 {strides = array<i32>} : memref<16x32xf32, #tpu.memory_space<vmem>>, vector<16x32xf32>,
    } else {
    }
    return
  }
  func.func @transform_0(%arg0: i32, %arg1: i32, %arg2: i32) -> (i32, i32) {
    %c0_i32 = arith.constant 0 : i32
    return %arg0, %arg2 : i32, i32
  }
  func.func @transform_1(%arg0: i32, %arg1: i32, %arg2: i32) -> (i32, i32) {
    %c0_i32 = arith.constant 0 : i32
    return %arg2, %arg1 : i32, i32
  }
  func.func @transform_2(%arg0: i32, %arg1: i32, %arg2: i32) -> (i32, i32) {
    %c0_i32 = arith.constant 0 : i32
    %c0_i32_0 = arith.constant 0 : i32
    return %c0_i32, %arg1 : i32, i32
  }
  func.func @transform_3(%arg0: i32, %arg1: i32, %arg2: i32) -> (i32, i32) {
    %c0_i32 = arith.constant 0 : i32
    return %arg0, %arg1 : i32, i32
  }
  func.func @transform_4(%arg0: i32, %arg1: i32, %arg2: i32) -> (i32, i32) {
    %c0_i32 = arith.constant 0 : i32
    return %arg0, %arg1 : i32, i32
  }
}

module attributes {stable_mosaic.version = 11 : i64} {
  func.func @_ln_linear_kernel(%arg0: i32, %arg1: i32, %arg2: memref<16x32xf32, #tpu.memory_space<vmem>>, %arg3: memref<1x32xf32, #tpu.memory_space<vmem>>, %arg4: memref<1x32xf32, #tpu.memory_space<vmem>>, %arg5: memref<32x128xbf16, #tpu.memory_space<vmem>>, %arg6: memref<1x128xf32, #tpu.memory_space<vmem>>, %arg7: memref<16x128xbf16, #tpu.memory_space<vmem>>, %arg8: memref<16x32xbf16, #tpu.memory_space<vmem>>) attributes {dimension_semantics = [#tpu.dimension_semantics<parallel>, #tpu.dimension_semantics<arbitrary>], iteration_bounds = array<i64: 1, 1>, scalar_prefetch = 0 : i64, scratch_operands = 1 : i64, tpu.core_type = #tpu.core_type<tc>, window_params = [{transform_indices = @transform_0, window_bounds = array<i64: 16, 32>}, {pipeline_mode = #tpu.pipeline_mode<synchronous>, transform_indices = @transform_1, window_bounds = array<i64: 1, 32>}, {pipeline_mode = #tpu.pipeline_mode<synchronous>, transform_indices = @transform_2, window_bounds = array<i64: 1, 32>}, {transform_indices = @transform_3, window_bounds = array<i64: 32, 128>}, {transform_indices = @transform_4, window_bounds = array<i64: 1, 128>}, {transform_indices = @transform_5, window_bounds = array<i64: 16, 128>}]} {
    %c0_i32 = arith.constant 0 : i32
    %0 = arith.cmpi eq, %arg1, %c0_i32 : i32
    %1 = arith.extui %0 : i1 to i32
    %c0_i32_0 = arith.constant 0 : i32
    %2 = arith.cmpi ne, %1, %c0_i32_0 : i32
    scf.if %2 {
      %c0_11 = arith.constant 0 : index
      %c0_12 = arith.constant 0 : index
      %19 = vector.load %arg2[%c0_11, %c0_12] : memref<16x32xf32, #tpu.memory_space<vmem>>, vector<16x32xf32>
      %cst_13 = arith.constant dense<0.000000e+00> : vector<16xf32>
      %20 = vector.multi_reduction <add>, %19, %cst_13 [1] : vector<16x32xf32> to vector<16xf32>
      %21 = vector.shape_cast %20 : vector<16xf32> to vector<16x1xf32>
      %cst_14 = arith.constant 3.200000e+01 : f32
      %22 = vector.broadcast %cst_14 : f32 to vector<16x1xf32>
      %23 = arith.divf %21, %22 : vector<16x1xf32>
      %24 = vector.broadcast %23 : vector<16x1xf32> to vector<16x32xf32>
      %25 = arith.subf %19, %24 : vector<16x32xf32>
      %26 = arith.mulf %25, %25 : vector<16x32xf32>
      %cst_15 = arith.constant dense<0.000000e+00> : vector<16xf32>
      %27 = vector.multi_reduction <add>, %26, %cst_15 [1] : vector<16x32xf32> to vector<16xf32>
      %28 = vector.shape_cast %27 : vector<16xf32> to vector<16x1xf32>
      %cst_16 = arith.constant 3.200000e+01 : f32
      %29 = vector.broadcast %cst_16 : f32 to vector<16x1xf32>
      %30 = arith.divf %28, %29 : vector<16x1xf32>
      %cst_17 = arith.constant 9.99999974E-6 : f32
      %31 = vector.broadcast %cst_17 : f32 to vector<16x1xf32>
      %32 = arith.addf %30, %31 : vector<16x1xf32>
      %33 = math.rsqrt %32 : vector<16x1xf32>
      %34 = vector.broadcast %33 : vector<16x1xf32> to vector<16x32xf32>
      %35 = arith.mulf %25, %34 : vector<16x32xf32>
      %c0_18 = arith.constant 0 : index
      %c0_19 = arith.constant 0 : index
      %36 = vector.load %arg3[%c0_18, %c0_19] : memref<1x32xf32, #tpu.memory_space<vmem>>, vector<1x32xf32>
      %37 = vector.broadcast %36 : vector<1x32xf32> to vector<16x32xf32>
      %38 = arith.mulf %35, %37 : vector<16x32xf32>
      %c0_20 = arith.constant 0 : index
      %c0_21 = arith.constant 0 : index
      %39 = vector.load %arg4[%c0_20, %c0_21] : memref<1x32xf32, #tpu.memory_space<vmem>>, vector<1x32xf32>
      %40 = vector.broadcast %39 : vector<1x32xf32> to vector<16x32xf32>
      %41 = arith.addf %38, %40 : vector<16x32xf32>
      %42 = arith.truncf %41 : vector<16x32xf32> to vector<16x32xbf16>
      %c0_22 = arith.constant 0 : index
      %c0_23 = arith.constant 0 : index
      %43 = vector.load %arg8[%c0_22, %c0_23] : memref<16x32xbf16, #tpu.memory_space<vmem>>, vector<16x32xbf16>
      tpu.vector_store %arg8[%c0_22, %c0_23], %42 {strides = array<i32>} : memref<16x32xbf16, #tpu.memory_space<vmem>>, vector<16x32xbf16>,
    } else {
    }
    %c0 = arith.constant 0 : index
    %c0_1 = arith.constant 0 : index
    %3 = vector.load %arg8[%c0, %c0_1] : memref<16x32xbf16, #tpu.memory_space<vmem>>, vector<16x32xbf16>
    %c0_2 = arith.constant 0 : index
    %c0_3 = arith.constant 0 : index
    %4 = vector.load %arg5[%c0_2, %c0_3] : memref<32x128xbf16, #tpu.memory_space<vmem>>, vector<32x128xbf16>
    %cst = arith.constant dense<0.000000e+00> : vector<16x128xf32>
    %5 = tpu.matmul %3, %4, %cst {dimension_numbers = #tpu.dot_dimension_numbers<[1], [0], [0], [1], [0, 0, 1, 1], [], []>} : vector<16x32xbf16>, vector<32x128xbf16>, vector<16x128xf32> -> vector<16x128xf32>
    %c0_4 = arith.constant 0 : index
    %c0_5 = arith.constant 0 : index
    %6 = vector.load %arg6[%c0_4, %c0_5] : memref<1x128xf32, #tpu.memory_space<vmem>>, vector<1x128xf32>
    %7 = vector.broadcast %6 : vector<1x128xf32> to vector<16x128xf32>
    %8 = arith.addf %5, %7 : vector<16x128xf32>
    %cst_6 = arith.constant 5.000000e-01 : f32
    %9 = vector.broadcast %cst_6 : f32 to vector<16x128xf32>
    %10 = arith.mulf %9, %8 : vector<16x128xf32>
    %cst_7 = arith.constant 0.707106769 : f32
    %11 = vector.broadcast %cst_7 : f32 to vector<16x128xf32>
    %12 = arith.mulf %8, %11 : vector<16x128xf32>
    %13 = math.erf %12 : vector<16x128xf32>
    %cst_8 = arith.constant 1.000000e+00 : f32
    %14 = vector.broadcast %cst_8 : f32 to vector<16x128xf32>
    %15 = arith.addf %14, %13 : vector<16x128xf32>
    %16 = arith.mulf %10, %15 : vector<16x128xf32>
    %17 = arith.truncf %16 : vector<16x128xf32> to vector<16x128xbf16>
    %c0_9 = arith.constant 0 : index
    %c0_10 = arith.constant 0 : index
    %18 = vector.load %arg7[%c0_9, %c0_10] : memref<16x128xbf16, #tpu.memory_space<vmem>>, vector<16x128xbf16>
    tpu.vector_store %arg7[%c0_9, %c0_10], %17 {strides = array<i32>} : memref<16x128xbf16, #tpu.memory_space<vmem>>, vector<16x128xbf16>,
    return
  }
  func.func @transform_0(%arg0: i32, %arg1: i32) -> (i32, i32) {
    %c0_i32 = arith.constant 0 : i32
    %c0_i32_0 = arith.constant 0 : i32
    return %arg0, %c0_i32 : i32, i32
  }
  func.func @transform_1(%arg0: i32, %arg1: i32) -> (i32, i32) {
    %c0_i32 = arith.constant 0 : i32
    %c0_i32_0 = arith.constant 0 : i32
    %c0_i32_1 = arith.constant 0 : i32
    return %c0_i32, %c0_i32_0 : i32, i32
  }
  func.func @transform_2(%arg0: i32, %arg1: i32) -> (i32, i32) {
    %c0_i32 = arith.constant 0 : i32
    %c0_i32_0 = arith.constant 0 : i32
    %c0_i32_1 = arith.constant 0 : i32
    return %c0_i32, %c0_i32_0 : i32, i32
  }
  func.func @transform_3(%arg0: i32, %arg1: i32) -> (i32, i32) {
    %c0_i32 = arith.constant 0 : i32
    %c0_i32_0 = arith.constant 0 : i32
    return %c0_i32, %arg1 : i32, i32
  }
  func.func @transform_4(%arg0: i32, %arg1: i32) -> (i32, i32) {
    %c0_i32 = arith.constant 0 : i32
    %c0_i32_0 = arith.constant 0 : i32
    return %c0_i32, %arg1 : i32, i32
  }
  func.func @transform_5(%arg0: i32, %arg1: i32) -> (i32, i32) {
    %c0_i32 = arith.constant 0 : i32
    return %arg0, %arg1 : i32, i32
  }
}

module attributes {stable_mosaic.version = 11 : i64} {
  func.func @_linear_add_kernel(%arg0: i32, %arg1: i32, %arg2: i32, %arg3: memref<16x128xbf16, #tpu.memory_space<vmem>>, %arg4: memref<128x32xbf16, #tpu.memory_space<vmem>>, %arg5: memref<1x32xf32, #tpu.memory_space<vmem>>, %arg6: memref<16x32xf32, #tpu.memory_space<vmem>>, %arg7: memref<16x32xf32, #tpu.memory_space<vmem>>, %arg8: memref<16x32xf32, #tpu.memory_space<vmem>>) attributes {dimension_semantics = [#tpu.dimension_semantics<parallel>, #tpu.dimension_semantics<parallel>, #tpu.dimension_semantics<arbitrary>], iteration_bounds = array<i64: 1, 1, 1>, scalar_prefetch = 0 : i64, scratch_operands = 1 : i64, tpu.core_type = #tpu.core_type<tc>, window_params = [{transform_indices = @transform_0, window_bounds = array<i64: 16, 128>}, {transform_indices = @transform_1, window_bounds = array<i64: 128, 32>}, {transform_indices = @transform_2, window_bounds = array<i64: 1, 32>}, {transform_indices = @transform_3, window_bounds = array<i64: 16, 32>}, {transform_indices = @transform_4, window_bounds = array<i64: 16, 32>}]} {
    %c0_i32 = arith.constant 0 : i32
    %0 = arith.cmpi eq, %arg2, %c0_i32 : i32
    %1 = arith.extui %0 : i1 to i32
    %c0_i32_0 = arith.constant 0 : i32
    %2 = arith.cmpi ne, %1, %c0_i32_0 : i32
    scf.if %2 {
      %cst_10 = arith.constant 0.000000e+00 : f32
      %12 = vector.broadcast %cst_10 : f32 to vector<16x32xf32>
      %c0_11 = arith.constant 0 : index
      %c0_12 = arith.constant 0 : index
      %13 = vector.load %arg8[%c0_11, %c0_12] : memref<16x32xf32, #tpu.memory_space<vmem>>, vector<16x32xf32>
      tpu.vector_store %arg8[%c0_11, %c0_12], %12 {strides = array<i32>} : memref<16x32xf32, #tpu.memory_space<vmem>>, vector<16x32xf32>,
    } else {
    }
    %c0 = arith.constant 0 : index
    %c0_1 = arith.constant 0 : index
    %3 = vector.load %arg8[%c0, %c0_1] : memref<16x32xf32, #tpu.memory_space<vmem>>, vector<16x32xf32>
    %c0_2 = arith.constant 0 : index
    %c0_3 = arith.constant 0 : index
    %4 = vector.load %arg3[%c0_2, %c0_3] : memref<16x128xbf16, #tpu.memory_space<vmem>>, vector<16x128xbf16>
    %c0_4 = arith.constant 0 : index
    %c0_5 = arith.constant 0 : index
    %5 = vector.load %arg4[%c0_4, %c0_5] : memref<128x32xbf16, #tpu.memory_space<vmem>>, vector<128x32xbf16>
    %cst = arith.constant dense<0.000000e+00> : vector<16x32xf32>
    %6 = tpu.matmul %4, %5, %cst {dimension_numbers = #tpu.dot_dimension_numbers<[1], [0], [0], [1], [0, 0, 1, 1], [], []>} : vector<16x128xbf16>, vector<128x32xbf16>, vector<16x32xf32> -> vector<16x32xf32>
    %7 = arith.addf %3, %6 : vector<16x32xf32>
    %c0_6 = arith.constant 0 : index
    %c0_7 = arith.constant 0 : index
    %8 = vector.load %arg8[%c0_6, %c0_7] : memref<16x32xf32, #tpu.memory_space<vmem>>, vector<16x32xf32>
    tpu.vector_store %arg8[%c0_6, %c0_7], %7 {strides = array<i32>} : memref<16x32xf32, #tpu.memory_space<vmem>>, vector<16x32xf32>,
    %c0_i32_8 = arith.constant 0 : i32
    %9 = arith.cmpi eq, %arg2, %c0_i32_8 : i32
    %10 = arith.extui %9 : i1 to i32
    %c0_i32_9 = arith.constant 0 : i32
    %11 = arith.cmpi ne, %10, %c0_i32_9 : i32
    scf.if %11 {
      %c0_10 = arith.constant 0 : index
      %c0_11 = arith.constant 0 : index
      %12 = vector.load %arg8[%c0_10, %c0_11] : memref<16x32xf32, #tpu.memory_space<vmem>>, vector<16x32xf32>
      %c0_12 = arith.constant 0 : index
      %c0_13 = arith.constant 0 : index
      %13 = vector.load %arg5[%c0_12, %c0_13] : memref<1x32xf32, #tpu.memory_space<vmem>>, vector<1x32xf32>
      %14 = vector.broadcast %13 : vector<1x32xf32> to vector<16x32xf32>
      %15 = arith.addf %12, %14 : vector<16x32xf32>
      %c0_14 = arith.constant 0 : index
      %c0_15 = arith.constant 0 : index
      %16 = vector.load %arg6[%c0_14, %c0_15] : memref<16x32xf32, #tpu.memory_space<vmem>>, vector<16x32xf32>
      %17 = arith.addf %15, %16 : vector<16x32xf32>
      %c0_16 = arith.constant 0 : index
      %c0_17 = arith.constant 0 : index
      %18 = vector.load %arg7[%c0_16, %c0_17] : memref<16x32xf32, #tpu.memory_space<vmem>>, vector<16x32xf32>
      tpu.vector_store %arg7[%c0_16, %c0_17], %17 {strides = array<i32>} : memref<16x32xf32, #tpu.memory_space<vmem>>, vector<16x32xf32>,
    } else {
    }
    return
  }
  func.func @transform_0(%arg0: i32, %arg1: i32, %arg2: i32) -> (i32, i32) {
    %c0_i32 = arith.constant 0 : i32
    return %arg0, %arg2 : i32, i32
  }
  func.func @transform_1(%arg0: i32, %arg1: i32, %arg2: i32) -> (i32, i32) {
    %c0_i32 = arith.constant 0 : i32
    return %arg2, %arg1 : i32, i32
  }
  func.func @transform_2(%arg0: i32, %arg1: i32, %arg2: i32) -> (i32, i32) {
    %c0_i32 = arith.constant 0 : i32
    %c0_i32_0 = arith.constant 0 : i32
    return %c0_i32, %arg1 : i32, i32
  }
  func.func @transform_3(%arg0: i32, %arg1: i32, %arg2: i32) -> (i32, i32) {
    %c0_i32 = arith.constant 0 : i32
    return %arg0, %arg1 : i32, i32
  }
  func.func @transform_4(%arg0: i32, %arg1: i32, %arg2: i32) -> (i32, i32) {
    %c0_i32 = arith.constant 0 : i32
    return %arg0, %arg1 : i32, i32
  }
}

</mosaic_0001>

<bundles_post_ra>
// kernel: lion_block.5
= control target key start
LH: loop header
LB: loop body
LE: loop exit
PB: predicated region body
PF: predicated region fallthrough
CT: control target
= control target key end

     0   :  { %10 = vsyncpa [#allocation4], 0  ;;  %s533_s0 = inlined_call_operand.hbm [shape: f32[16,32], index: 0, kind: input, shape index: {}]   ;;  %s534_s1 = inlined_call_operand.hbm [shape: f32[1,32], index: 1, kind: input, shape index: {}]   ;;  %s535_s2 = inlined_call_operand.hbm [shape: f32[1,32], index: 2, kind: input, shape index: {}]   ;;  %s536_s3 = inlined_call_operand.hbm [shape: bf16[32,224], index: 3, kind: input, shape index: {}]   ;;  %s537_s4 = inlined_call_operand.hbm [shape: f32[1,224], index: 4, kind: input, shape index: {}]   ;;  %s538_s5 = inlined_call_operand.hbm [shape: f32[16,224], index: 5, kind: output, shape index: {}]  }
   0x1   :  { %11 = vsyncpa [#allocation7], 0 }
   0x2   :  { %12 = vsyncpa [#allocation10], 0 }
   0x3   :  { %13 = vsyncpa [#allocation5], 0  ;;  %s414_s18 = smov [#allocation6]   ;;  %s274_s22 = scalar_lea.hbm %s534_s1, 16 }
   0x4   :  { %s32_s19 = sshll.u32 %s414_s18, 4  ;;  %p275_p0 = scmp.ne.s32.totalorder %s534_s1, %s274_s22  ;;  %s33_s19 = int_to_ptr.vmem [resolvable:$true] %s32_s19 }
   0x5   :  { %p278_p1 = scmp.lt.u32.totalorder %s274_s22, %s534_s1 }
   0x7   :  { %p280_p2 = pnand %p278_p1, %p275_p0 }
   0x9   :  { %283 = shalt.err (!%p280_p2)
}
   0xa   :  { %s284_s27 = scalar_lea.vmem %s33_s19, 16  ;;  %s288_s28 = scalar_lea.vmem %s33_s19, 32 }
   0xb   :  { %p285_p3 = scmp.ne.s32.totalorder %s33_s19, %s284_s27  ;;  %p289_p4 = scmp.lt.s32.totalorder %s33_s19, %s33_s19 }
   0xc   :  { %p290_p5 = scmp.lt.s32.totalorder %s288_s28, %s284_s27 }
   0xe   :  { %p291_p6 = por %p290_p5, %p289_p4 }
  0x10   :  { %p292_p7 = pnand %p291_p6, %p285_p3 }
  0x12   :  { %295 = shalt.err (!%p292_p7)
}
  0x13   :  { %35 = dma.hbm_to_vmem [thread:$0]  %s534_s1, 16, %s33_s19, [#allocation7]  }
  0x14   :  { %s415_s6 = smov [#allocation9]   ;;  %s416_s8 = smov [#allocation3]  }
  0x15   :  { %s51_s7 = sshll.u32 %s415_s6, 4  ;;  %s19_s9 = sshll.u32 %s416_s8, 4  ;;  %s52_s7 = int_to_ptr.vmem [resolvable:$true] %s51_s7  ;;  %s20_s9 = int_to_ptr.vmem [resolvable:$true] %s19_s9 }
  0x16   :  { %s296_s12 = scalar_lea.hbm %s536_s3, 512 }
  0x17   :  { %p297_p8 = scmp.ne.s32.totalorder %s536_s3, %s296_s12  ;;  %p300_p9 = scmp.lt.u32.totalorder %s296_s12, %s536_s3 }
  0x19   :  { %p302_p10 = pnand %p300_p9, %p297_p8 }
  0x1b   :  { %305 = shalt.err (!%p302_p10)
}
  0x1c   :  { %s306_s1 = scalar_lea.vmem %s52_s7, 512  ;;  %p311_p12 = scmp.lt.s32.totalorder %s52_s7, %s52_s7 }
  0x1d   :  { %p307_p11 = scmp.ne.s32.totalorder %s52_s7, %s306_s1  ;;  %p312_p13 = scmp.lt.s32.totalorder %s306_s1, %s306_s1 }
  0x1f   :  { %p313_p0 = por %p312_p13, %p311_p12 }
  0x21   :  { %p314_p1 = pnand %p313_p0, %p307_p11 }
  0x23   :  { %317 = shalt.err (!%p314_p1)
}
  0x24   :  { %s417_s17 = smov 128   ;;  %s418_s18 = smov 8  }
  0x25   :  { %57 = dma.hbm_to_vmem [thread:$0]  %s536_s3, 512, %s52_s7, [#allocation10], %s417_s17, %s417_s17, %s418_s18  }
  0x26   :  { %s318_s23 = scalar_lea.hbm %s533_s0, 256 }
  0x27   :  { %p319_p2 = scmp.ne.s32.totalorder %s533_s0, %s318_s23  ;;  %p322_p3 = scmp.lt.u32.totalorder %s318_s23, %s533_s0 }
  0x29   :  { %p324_p4 = pnand %p322_p3, %p319_p2 }
  0x2b   :  { %327 = shalt.err (!%p324_p4)
}
  0x2c   :  { %s328_s28 = scalar_lea.vmem %s20_s9, 256  ;;  %p333_p6 = scmp.lt.s32.totalorder %s20_s9, %s20_s9 }
  0x2d   :  { %p329_p5 = scmp.ne.s32.totalorder %s20_s9, %s328_s28  ;;  %p334_p7 = scmp.lt.s32.totalorder %s328_s28, %s328_s28 }
  0x2f   :  { %p335_p8 = por %p334_p7, %p333_p6 }
  0x31   :  { %p336_p9 = pnand %p335_p8, %p329_p5 }
  0x33   :  { %339 = shalt.err (!%p336_p9)
}
  0x34   :  { %25 = dma.hbm_to_vmem [thread:$0]  %s533_s0, 256, %s20_s9, [#allocation4], %s417_s17, %s417_s17, %s418_s18  }
  0x35   :  { %s419_s30 = smov [#allocation8]   ;;  %s420_s7 = smov [#allocation11]  }
  0x36   :  { %s42_s6 = sshll.u32 %s419_s30, 4  ;;  %s64_s8 = sshll.u32 %s420_s7, 4  ;;  %s43_s6 = int_to_ptr.vmem [resolvable:$true] %s42_s6  ;;  %s65_s8 = int_to_ptr.vmem [resolvable:$true] %s64_s8 }
  0x37   :  { %s340_s12 = scalar_lea.hbm %s535_s2, 16 }
  0x38   :  { %p341_p10 = scmp.ne.s32.totalorder %s535_s2, %s340_s12  ;;  %p344_p11 = scmp.lt.u32.totalorder %s340_s12, %s535_s2 }
  0x3a   :  { %p346_p12 = pnand %p344_p11, %p341_p10 }
  0x3c   :  { %349 = shalt.err (!%p346_p12)
}
  0x3d   :  { %s350_s0 = scalar_lea.vmem %s43_s6, 16  ;;  %s354_s9 = scalar_lea.vmem %s43_s6, 32 }
  0x3e   :  { %p351_p13 = scmp.ne.s32.totalorder %s43_s6, %s350_s0  ;;  %p355_p0 = scmp.lt.s32.totalorder %s43_s6, %s43_s6 }
  0x3f   :  { %p356_p1 = scmp.lt.s32.totalorder %s354_s9, %s350_s0 }
  0x41   :  { %p357_p2 = por %p356_p1, %p355_p0 }
  0x43   :  { %p358_p3 = pnand %p357_p2, %p351_p13 }
  0x45   :  { %361 = shalt.err (!%p358_p3)
}
  0x46   :  { %45 = dma.hbm_to_vmem [thread:$0]  %s535_s2, 16, %s43_s6, [#allocation7]  }
  0x47   :  { %s362_s20 = scalar_lea.hbm %s537_s4, 32 }
  0x48   :  { %p363_p4 = scmp.ne.s32.totalorder %s537_s4, %s362_s20  ;;  %p366_p5 = scmp.lt.u32.totalorder %s362_s20, %s537_s4 }
  0x4a   :  { %p368_p6 = pnand %p366_p5, %p363_p4 }
  0x4c   :  { %371 = shalt.err (!%p368_p6)
}
  0x4d   :  { %s372_s25 = scalar_lea.vmem %s65_s8, 32  ;;  %p377_p8 = scmp.lt.s32.totalorder %s65_s8, %s65_s8 }
  0x4e   :  { %p373_p7 = scmp.ne.s32.totalorder %s65_s8, %s372_s25  ;;  %p378_p9 = scmp.lt.s32.totalorder %s372_s25, %s372_s25 }
  0x50   :  { %p379_p10 = por %p378_p9, %p377_p8 }
  0x52   :  { %p380_p11 = pnand %p379_p10, %p373_p7 }
  0x54   :  { %383 = shalt.err (!%p380_p11)
}
  0x55   :  { %67 = dma.hbm_to_vmem [thread:$0]  %s537_s4, 32, %s65_s8, [#allocation10]  }
  0x56   :  { %406 = dma.done.wait [#allocation4], 256  }
  0x57   :  { %407 = vsyncadd [#allocation4], 4294967040 }
  0x58   :  { %408 = dma.done.wait [#allocation7], 32  }
  0x59   :  { %409 = vsyncadd [#allocation7], 4294967264 }
  0x5a   :  { %410 = dma.done.wait [#allocation10], 544  }
  0x5b   :  { %411 = vsyncadd [#allocation10], 4294966752  ;;  %vm90_vm0 = vcmask 261120   ;;  %v88_v0 = vld [vmem:[#allocation3] sm:$0xff]  ;;  %v89_v1 = vld [vmem:[#allocation3 + $0x8] sm:$0xff]  ;;  %v421_v18 = vmov 0   ;;  %v145_v37 = vlaneseq }
  0x5c   :  { %v91_v2 = vsel %vm90_vm0, %v88_v0, 0.0  ;;  %v94_v3 = vsel %vm90_vm0, %v89_v1, 0.0  ;;  %v264_v14 = vld [vmem:[#allocation9 + $0x4] ss:$8 sps:$4 sm:$0xff]   ;;  %v266_v15 = vld [vmem:[#allocation9] ss:$8 sps:$4 sm:$0xff]   ;;  %211 = vmatprep.mubr.bf16.mxu0 %v421_v18 }
  0x5d   :  { %92 = vadd.xlane.f32.xlu0 %v91_v2  ;;  %179 = vmatprep.subr.bf16.mxu0 %v264_v14  ;;  %v267_v16 = vld [vmem:[#allocation9 + $0x14] ss:$8 sps:$4 sm:$0xff]   ;;  %v269_v17 = vld [vmem:[#allocation9 + $0x10] ss:$8 sps:$4 sm:$0xff]   ;;  %v146_v38 = vshrl.u32 %v145_v37, 7  ;;  %s422_s4 = smov [#allocation12]  }
  0x5e   :  { %180 = vmatpush1.bf16.msra.mxu0 %v266_v15  ;;  %v246_v27 = vld [vmem:[#allocation6] ss:$0 sm:$0xff]  ;;  %v247_v31 = vld [vmem:[#allocation8] ss:$0 sm:$0xff]  ;;  %v143_v40 = vld [vmem:[#allocation11] sm:$0x3] }
  0x5f   :  { %181 = vmatprep.subr.bf16.mxu0 %v267_v16  ;;  %v147_v39 = vsub.s32 0, %v146_v38  ;;  %v151_v41 = vsub.s32 1, %v146_v38  ;;  %s232_s27 = sshll.u32 %s422_s4, 4  ;;  %vm223_vm1 = vcmask 785408   ;;  %s233_s27 = int_to_ptr.vmem [resolvable:$true] %s232_s27 }
  0x60   :  { %s384_s28 = scalar_lea.vmem %s233_s27, 512  ;;  %p389_p13 = scmp.lt.s32.totalorder %s233_s27, %s233_s27 }
  0x61   :  { %95 = vadd.xlane.f32.xlu0 %v94_v3  ;;  %v148_v42 = vrot.slane %v143_v40, %v147_v39  ;;  %v152_v43 = vrot.slane %v143_v40, %v151_v41  ;;  %p385_p12 = scmp.ne.s32.totalorder %s233_s27, %s384_s28  ;;  %p390_p0 = scmp.lt.s32.totalorder %s384_s28, %s384_s28 }
  0x62   :  { %182 = vmatpush1.bf16.msra.mxu0 %v269_v17 }
  0x63   :  { %p391_p1 = por %p390_p0, %p389_p13 }
  0x65   :  { %p392_p2 = pnand %p391_p1, %p385_p12 }
  0xea   :  { %v93_v4 = vpop.xlane.xlu0 %92 }
  0xeb   :  { %v98_v5 = vmul.f32 0.03125, %v93_v4 }
  0xed   :  { %v100_v6 = vsub.f32 %v88_v0, %v98_v5 }
  0xee   :  { %v96_v7 = vpop.xlane.xlu0 %95 }
  0xef   :  { %v99_v8 = vmul.f32 0.03125, %v96_v7  ;;  %v102_v9 = vmul.f32 %v100_v6, %v100_v6 }
  0xf1   :  { %v101_v10 = vsub.f32 %v89_v1, %v99_v8  ;;  %v104_v11 = vsel %vm90_vm0, %v102_v9, 0.0 }
  0xf2   :  { %105 = vadd.xlane.f32.xlu1 %v104_v11 }
  0xf3   :  { %v103_v12 = vmul.f32 %v101_v10, %v101_v10 }
  0xf5   :  { %v107_v13 = vsel %vm90_vm0, %v103_v12, 0.0 }
  0xf6   :  { %108 = vadd.xlane.f32.xlu1 %v107_v13 }
 0x17f   :  { %v106_v19 = vpop.xlane.xlu1 %105 }
 0x180   :  { %v110_v20 = vmul.f32 0.03125, %v106_v19 }
 0x182   :  { %v112_v21 = vadd.f32 1e-05, %v110_v20 }
 0x183   :  { %v109_v22 = vpop.xlane.xlu1 %108 }
 0x184   :  { %270 = vrsqrt.f32 %v112_v21  ;;  %v111_v23 = vmul.f32 0.03125, %v109_v22 }
 0x186   :  { %v113_v24 = vadd.f32 1e-05, %v111_v23 }
 0x188   :  { %272 = vrsqrt.f32 %v113_v24 }
 0x18e   :  { %v271_v25 = vpop.eup %270 }
 0x18f   :  { %v116_v26 = vmul.f32 %v271_v25, %v100_v6 }
 0x191   :  { %v125_v29 = vmul.f32 %v246_v27, %v116_v26 }
 0x192   :  { %v273_v28 = vpop.eup %272 }
 0x193   :  { %v117_v30 = vmul.f32 %v273_v28, %v101_v10  ;;  %v134_v33 = vadd.f32 %v247_v31, %v125_v29 }
 0x195   :  { %v126_v32 = vmul.f32 %v246_v27, %v117_v30 }
 0x197   :  { %v135_v34 = vadd.f32 %v247_v31, %v126_v32 }
 0x199   :  { %v136_v35 = vpack.c.bf16 %v135_v34, %v134_v33 }
 0x19b   :  { %137 = vst.msk [vmem:[#allocation2] sm:$0xff] %vm90_vm0, %v136_v35 }
 0x1a2   :  { %v138_v36 = vld [vmem:[#allocation2] sm:$0xff] }
 0x1a3   :  { %252 = vmatmul.mubr.msk.bf16.vlgmr.msra.gmra.mrb[0].mxu0 %vm90_vm0, %v138_v36 }
 0x276   :  { %v213_v44 = vpop.f32.mrb[0].mxu0 }
 0x277   :  { %v214_v45 = vadd.f32 %v213_v44, %v148_v42  ;;  %v215_v46 = vpop.f32.mrb[1].mxu0 }
 0x278   :  { %v216_v47 = vadd.f32 %v215_v46, %v152_v43  ;;  %v217_v48 = vpop.f32.mrb[2].mxu0 }
 0x279   :  { %222 = vst [vmem:[#allocation12] sm:$0xff] %v214_v45  ;;  %v218_v49 = vadd.f32 %v217_v48, %v148_v42  ;;  %v219_v50 = vpop.f32.mrb[3].mxu0 }
 0x27a   :  { %224 = vst.msk [vmem:[#allocation12 + $0x8] sm:$0xff] %vm223_vm1, %v216_v47  ;;  %v220_v51 = vadd.f32 %v219_v50, %v152_v43 }
 0x27b   :  { %225 = vst [vmem:[#allocation12 + $0x10] sm:$0xff] %v218_v49 }
 0x27c   :  { %226 = vst.msk [vmem:[#allocation12 + $0x18] sm:$0xff] %vm223_vm1, %v220_v51 }
 0x27d   :  { %395 = shalt.err (!%p392_p2)
}
 0x27e   :  { %s396_s30 = scalar_lea.hbm %s538_s5, 512 }
 0x27f   :  { %p397_p3 = scmp.ne.s32.totalorder %s538_s5, %s396_s30  ;;  %p400_p4 = scmp.lt.u32.totalorder %s396_s30, %s538_s5 }
 0x281   :  { %p402_p5 = pnand %p400_p4, %p397_p3 }
 0x283   :  { %405 = shalt.err (!%p402_p5)
}
 0x284   :  { %s423_s11 = smov 256   ;;  %s424_s12 = smov 16  }
 0x285   :  { %238 = dma.vmem_to_hbm [thread:$0]  %s233_s27, 512, %s538_s5, [#allocation5], %s423_s11, %s423_s11, %s424_s12  }
 0x286   :  { %412 = dma.done.wait [#allocation5], 512  }
 0x287   :  { %413 = vsyncadd [#allocation5], 4294966784 }
 0x288   :  { %242 = vsyncpa [#allocation4], 1 }
 0x289   :  { %243 = vsyncpa [#allocation7], 1 }
 0x28a   :  { %244 = vsyncpa [#allocation10], 1 }
 0x28b   :  { %245 = vsyncpa [#allocation5], 1 }

// kernel: lion_block.7
= control target key start
LH: loop header
LB: loop body
LE: loop exit
PB: predicated region body
PF: predicated region fallthrough
CT: control target
= control target key end

     0   :  { %9 = vsyncpa [#allocation4], 0  ;;  %s463_s0 = inlined_call_operand.hbm [shape: bf16[16,32], index: 0, kind: input, shape index: {}]   ;;  %s464_s1 = inlined_call_operand.hbm [shape: bf16[32,32], index: 1, kind: input, shape index: {}]   ;;  %s465_s2 = inlined_call_operand.hbm [shape: f32[1,32], index: 2, kind: input, shape index: {}]   ;;  %s466_s3 = inlined_call_operand.hbm [shape: f32[16,32], index: 3, kind: input, shape index: {}]   ;;  %s467_s4 = inlined_call_operand.hbm [shape: f32[16,32], index: 4, kind: output, shape index: {}]  }
   0x1   :  { %10 = vsyncpa [#allocation7], 0 }
   0x2   :  { %11 = vsyncpa [#allocation10], 0 }
   0x3   :  { %12 = vsyncpa [#allocation5], 0  ;;  %s340_s15 = smov [#allocation6]   ;;  %s341_s17 = smov [#allocation3]  }
   0x4   :  { %s30_s16 = sshll.u32 %s340_s15, 4  ;;  %s18_s18 = sshll.u32 %s341_s17, 4  ;;  %s31_s16 = int_to_ptr.vmem [resolvable:$true] %s30_s16  ;;  %s376_s18 = int_to_ptr.vmem [resolvable:$true] %s18_s18 }
   0x5   :  { %s222_s21 = scalar_lea.hbm %s464_s1, 256 }
   0x6   :  { %p223_p0 = scmp.ne.s32.totalorder %s464_s1, %s222_s21  ;;  %p226_p1 = scmp.lt.u32.totalorder %s222_s21, %s464_s1 }
   0x8   :  { %p228_p2 = pnand %p226_p1, %p223_p0 }
   0xa   :  { %231 = shalt.err (!%p228_p2)
}
   0xb   :  { %s232_s26 = scalar_lea.vmem %s31_s16, 256  ;;  %p237_p4 = scmp.lt.s32.totalorder %s31_s16, %s31_s16 }
   0xc   :  { %p233_p3 = scmp.ne.s32.totalorder %s31_s16, %s232_s26  ;;  %p238_p5 = scmp.lt.s32.totalorder %s232_s26, %s232_s26 }
   0xe   :  { %p239_p6 = por %p238_p5, %p237_p4 }
  0x10   :  { %p240_p7 = pnand %p239_p6, %p233_p3 }
  0x12   :  { %243 = shalt.err (!%p240_p7)
}
  0x13   :  { %s342_s27 = smov 64   ;;  %s343_s28 = smov 4  }
  0x14   :  { %36 = dma.hbm_to_vmem [thread:$0]  %s464_s1, 256, %s31_s16, [#allocation7], %s342_s27, %s342_s27, %s343_s28  }
  0x15   :  { %s244_s7 = scalar_lea.hbm %s463_s0, 128 }
  0x16   :  { %p245_p8 = scmp.ne.s32.totalorder %s463_s0, %s244_s7  ;;  %p248_p9 = scmp.lt.u32.totalorder %s244_s7, %s463_s0 }
  0x18   :  { %p250_p10 = pnand %p248_p9, %p245_p8 }
  0x1a   :  { %253 = shalt.err (!%p250_p10)
}
  0x1b   :  { %s254_s12 = scalar_lea.vmem %s376_s18, 128  ;;  %p259_p12 = scmp.lt.s32.totalorder %s376_s18, %s376_s18 }
  0x1c   :  { %p255_p11 = scmp.ne.s32.totalorder %s376_s18, %s254_s12  ;;  %p260_p13 = scmp.lt.s32.totalorder %s254_s12, %s254_s12 }
  0x1e   :  { %p261_p0 = por %p260_p13, %p259_p12 }
  0x20   :  { %p262_p1 = pnand %p261_p0, %p255_p11 }
  0x22   :  { %265 = shalt.err (!%p262_p1)
}
  0x23   :  { %24 = dma.hbm_to_vmem [thread:$0]  %s463_s0, 128, %s376_s18, [#allocation4], %s342_s27, %s342_s27, %s343_s28  }
  0x24   :  { %s344_s14 = smov [#allocation8]   ;;  %s345_s16 = smov [#allocation9]  }
  0x25   :  { %s43_s15 = sshll.u32 %s344_s14, 4  ;;  %s52_s17 = sshll.u32 %s345_s16, 4  ;;  %s44_s15 = int_to_ptr.vmem [resolvable:$true] %s43_s15  ;;  %s407_s17 = int_to_ptr.vmem [resolvable:$true] %s52_s17 }
  0x26   :  { %s266_s21 = scalar_lea.hbm %s465_s2, 16 }
  0x27   :  { %p267_p2 = scmp.ne.s32.totalorder %s465_s2, %s266_s21  ;;  %p270_p3 = scmp.lt.u32.totalorder %s266_s21, %s465_s2 }
  0x29   :  { %p272_p4 = pnand %p270_p3, %p267_p2 }
  0x2b   :  { %275 = shalt.err (!%p272_p4)
}
  0x2c   :  { %s276_s0 = scalar_lea.vmem %s44_s15, 16  ;;  %s280_s18 = scalar_lea.vmem %s44_s15, 32 }
  0x2d   :  { %p277_p5 = scmp.ne.s32.totalorder %s44_s15, %s276_s0  ;;  %p281_p6 = scmp.lt.s32.totalorder %s44_s15, %s44_s15 }
  0x2e   :  { %p282_p7 = scmp.lt.s32.totalorder %s280_s18, %s276_s0 }
  0x30   :  { %p283_p8 = por %p282_p7, %p281_p6 }
  0x32   :  { %p284_p9 = pnand %p283_p8, %p277_p5 }
  0x34   :  { %287 = shalt.err (!%p284_p9)
}
  0x35   :  { %46 = dma.hbm_to_vmem [thread:$0]  %s465_s2, 16, %s44_s15, [#allocation7]  }
  0x36   :  { %s288_s30 = scalar_lea.hbm %s466_s3, 256 }
  0x37   :  { %p289_p10 = scmp.ne.s32.totalorder %s466_s3, %s288_s30  ;;  %p292_p11 = scmp.lt.u32.totalorder %s288_s30, %s466_s3 }
  0x39   :  { %p294_p12 = pnand %p292_p11, %p289_p10 }
  0x3b   :  { %297 = shalt.err (!%p294_p12)
}
  0x3c   :  { %s298_s9 = scalar_lea.vmem %s407_s17, 256  ;;  %p303_p0 = scmp.lt.s32.totalorder %s407_s17, %s407_s17 }
  0x3d   :  { %p299_p13 = scmp.ne.s32.totalorder %s407_s17, %s298_s9  ;;  %p304_p1 = scmp.lt.s32.totalorder %s298_s9, %s298_s9 }
  0x3f   :  { %p305_p2 = por %p304_p1, %p303_p0 }
  0x41   :  { %p306_p3 = pnand %p305_p2, %p299_p13 }
  0x43   :  { %309 = shalt.err (!%p306_p3)
}
  0x44   :  { %s346_s2 = smov 128   ;;  %s347_s10 = smov 8  }
  0x45   :  { %58 = dma.hbm_to_vmem [thread:$0]  %s466_s3, 256, %s407_s17, [#allocation10], %s346_s2, %s346_s2, %s347_s10  }
  0x46   :  { %332 = dma.done.wait [#allocation4], 128  }
  0x47   :  { %333 = vsyncadd [#allocation4], 4294967168 }
  0x48   :  { %334 = dma.done.wait [#allocation7], 272  }
  0x49   :  { %335 = vsyncadd [#allocation7], 4294967024 }
  0x4a   :  { %336 = dma.done.wait [#allocation10], 256  }
  0x4b   :  { %337 = vsyncadd [#allocation10], 4294967040  ;;  %vm76_vm0 = vcmask 261120   ;;  %v348_v0 = vmov 0.0   ;;  %vm349_vm1 = vmmov 0   ;;  %v219_v1 = vld [vmem:[#allocation6] sm:$0xff]  }
  0x4c   :  { %200 = vmatprep.subr.bf16.mxu0 %v348_v0  ;;  %204 = vmatprep.mubr.msk.bf16.mxu0 %vm349_vm1, %v348_v0  ;;  %77 = vst.msk [vmem:[#allocation2] sm:$0xff] %vm76_vm0, %v348_v0  ;;  %78 = vst.msk [vmem:[#allocation2 + $0x8] sm:$0xff] %vm76_vm0, %v348_v0  ;;  %v220_v2 = vld [vmem:[#allocation6 + $0x8] sm:$0xff]   ;;  %v221_v3 = vld [vmem:[#allocation3] sm:$0xff]   ;;  %s350_s3 = smov [#allocation11]  }
  0x4d   :  { %201 = vmatpush3.bf16.msra.mxu0 %v219_v1  ;;  %v196_v12 = vld [vmem:[#allocation8] ss:$0 sm:$0xff]  ;;  %v167_v14 = vld [vmem:[#allocation9] sm:$0xff]  ;;  %v168_v17 = vld [vmem:[#allocation9 + $0x8] sm:$0xff]  ;;  %s178_s1 = sshll.u32 %s350_s3, 4  ;;  %s179_s1 = int_to_ptr.vmem [resolvable:$true] %s178_s1 }
  0x4e   :  { %202 = vmatprep.subr.bf16.mxu0 %v348_v0  ;;  %s310_s13 = scalar_lea.vmem %s179_s1, 256  ;;  %p315_p5 = scmp.lt.s32.totalorder %s179_s1, %s179_s1 }
  0x4f   :  { %p311_p4 = scmp.ne.s32.totalorder %s179_s1, %s310_s13  ;;  %p316_p6 = scmp.lt.s32.totalorder %s310_s13, %s310_s13 }
  0x51   :  { %203 = vmatpush3.bf16.msra.mxu0 %v220_v2  ;;  %p317_p7 = por %p316_p6, %p315_p5 }
  0x53   :  { %v79_v4 = vld [vmem:[#allocation2] sm:$0xff]  ;;  %v80_v6 = vld [vmem:[#allocation2 + $0x8] sm:$0xff]  ;;  %p318_p8 = pnand %p317_p7, %p311_p4 }
  0x54   :  { %205 = vmatmul.mubr.msk.bf16.vlgmr.msra.gmra.mrb[0].mxu0 %vm76_vm0, %v221_v3 }
 0x127   :  { %v142_v5 = vpop.f32.mrb[0].mxu0 }
 0x128   :  { %v149_v7 = vadd.f32 %v142_v5, %v79_v4  ;;  %v206_v8 = vpop.f32.mrb[1].mxu0 }
 0x129   :  { %v145_v9 = vpop.f32.mrb[2].mxu0 }
 0x12a   :  { %151 = vst.msk [vmem:[#allocation2] sm:$0xff] %vm76_vm0, %v149_v7  ;;  %v150_v10 = vadd.f32 %v145_v9, %v80_v6  ;;  %v207_v11 = vpop.f32.mrb[3].mxu0 }
 0x12c   :  { %152 = vst.msk [vmem:[#allocation2 + $0x8] sm:$0xff] %vm76_vm0, %v150_v10 }
 0x131   :  { %v156_v13 = vld [vmem:[#allocation2] sm:$0xff] }
 0x132   :  { %v165_v15 = vadd.f32 %v196_v12, %v156_v13 }
 0x133   :  { %v157_v16 = vld [vmem:[#allocation2 + $0x8] sm:$0xff] }
 0x134   :  { %v166_v18 = vadd.f32 %v196_v12, %v157_v16  ;;  %v169_v19 = vadd.f32 %v167_v14, %v165_v15 }
 0x136   :  { %v170_v20 = vadd.f32 %v168_v17, %v166_v18  ;;  %171 = vst.msk [vmem:[#allocation11] sm:$0xff] %vm76_vm0, %v169_v19 }
 0x138   :  { %172 = vst.msk [vmem:[#allocation11 + $0x8] sm:$0xff] %vm76_vm0, %v170_v20 }
 0x139   :  { %321 = shalt.err (!%p318_p8)
}
 0x13a   :  { %s322_s16 = scalar_lea.hbm %s467_s4, 256 }
 0x13b   :  { %p323_p9 = scmp.ne.s32.totalorder %s467_s4, %s322_s16  ;;  %p326_p10 = scmp.lt.u32.totalorder %s322_s16, %s467_s4 }
 0x13d   :  { %p328_p11 = pnand %p326_p10, %p323_p9 }
 0x13f   :  { %331 = shalt.err (!%p328_p11)
}
 0x140   :  { %184 = dma.vmem_to_hbm [thread:$0]  %s179_s1, 256, %s467_s4, [#allocation5], %s346_s2, %s346_s2, %s347_s10  }
 0x141   :  { %338 = dma.done.wait [#allocation5], 256  }
 0x142   :  { %339 = vsyncadd [#allocation5], 4294967040 }
 0x143   :  { %188 = vsyncpa [#allocation4], 1 }
 0x144   :  { %189 = vsyncpa [#allocation7], 1 }
 0x145   :  { %190 = vsyncpa [#allocation10], 1 }
 0x146   :  { %191 = vsyncpa [#allocation5], 1 }

// kernel: lion_block.6
= control target key start
LH: loop header
LB: loop body
LE: loop exit
PB: predicated region body
PF: predicated region fallthrough
CT: control target
= control target key end

     0   :  { %s2636_s0 = inlined_call_operand.hbm [shape: bf16[2,4,8,8], index: 0, kind: input, shape index: {}]   ;;  %s2637_s1 = inlined_call_operand.hbm [shape: bf16[2,4,8,8], index: 1, kind: input, shape index: {}]   ;;  %s2638_s2 = inlined_call_operand.hbm [shape: bf16[2,4,8,8], index: 2, kind: input, shape index: {}]   ;;  %s2639_s3 = inlined_call_operand.hbm [shape: f32[2,4,8], index: 3, kind: input, shape index: {}, may-alias: {3,5}]   ;;  %s2640_s4 = inlined_call_operand.hbm [shape: f32[2,4,8], index: 4, kind: input, shape index: {}, may-alias: {4,6}]   ;;  %s2641_s5 = inlined_call_operand.hbm [shape: f32[2,4,8], index: 5, kind: input, shape index: {}, may-alias: {3,5}]   ;;  %s2642_s6 = inlined_call_operand.hbm [shape: f32[2,4,8], index: 6, kind: input, shape index: {}, may-alias: {4,6}]   ;;  %s2643_s7 = inlined_call_operand.hbm [shape: bf16[2,4,8,8], index: 7, kind: output, shape index: {}]  }
   0x1   :  { %2661 = sst [smem:[#allocation29_spill]] %s2636_s0 }
   0x2   :  { %2662 = sst [smem:[#allocation30_spill]] %s2637_s1 }
   0x3   :  { %2663 = sst [smem:[#allocation31_spill]] %s2639_s3 }
   0x4   :  { %2664 = sst [smem:[#allocation32_spill]] %s2641_s5 }
   0x5   :  { %2665 = sst [smem:[#allocation33_spill]] %s2643_s7 }
   0x6   :  { %12 = vsyncpa [#allocation5], 0 }
   0x7   :  { %14 = vsyncpa [#allocation5 + $0x1], 0 }
   0x8   :  { %15 = vsyncpa [#allocation8], 0 }
   0x9   :  { %17 = vsyncpa [#allocation8 + $0x1], 0 }
   0xa   :  { %18 = vsyncpa [#allocation11], 0 }
   0xb   :  { %20 = vsyncpa [#allocation11 + $0x1], 0 }
   0xc   :  { %21 = vsyncpa [#allocation14], 0 }
   0xd   :  { %23 = vsyncpa [#allocation14 + $0x1], 0 }
   0xe   :  { %24 = vsyncpa [#allocation6], 0 }
   0xf   :  { %26 = vsyncpa [#allocation6 + $0x1], 0  ;;  %s2083_s24 = smov 0   ;;  %s2085_s25 = smov 0  }
  0x10   :  { %s2087_s26 = smov 0   ;;  %s2089_s27 = smov 0  }
  0x11   :  { %s2091_s28 = smov 0   ;;  %s2093_s29 = smov 0  }
  0x12 LB: > { %2666 = sst [smem:[#allocation22_spill]] %s2006_s24  ;;  %s2114_s30 = sadd.s32 4294967295, %s2026_s29   ;;  %s2026_s29 = sphi %s2093_s29, %s32_s29   ;;  %s2022_s28 = sphi %s2091_s28, %s2710_s28   ;;  %s2018_s27 = sphi %s2089_s27, %s2709_s27   ;;  %s2014_s26 = sphi %s2087_s26, %s2713_s26   ;;  %s2010_s25 = sphi %s2085_s25, %s2712_s25   ;;  %s2006_s24 = sphi %s2083_s24, %s2711_s24  }
  0x13   : > { %2667 = sst [smem:[#allocation23_spill]] %s2014_s26  ;;  %s1495_s8 = sadd.s32 4294967294, %s2026_s29  }
  0x14   : > { %2668 = sst [smem:[#allocation24_spill]] %s2022_s28  ;;  %s51_s9 = sadd.s32 1, %s2022_s28 }
  0x15   : > { %2669 = sst [smem:[#allocation25_spill]] %s2026_s29  ;;  %s60_s10 = sadd.s32 1, %s2014_s26 }
  0x16   : > { %p53_p0 = scmp.ge.s32.totalorder %s51_s9, 2  ;;  %p67_p1 = scmp.ne.s32.totalorder %s2014_s26, %s2010_s25 }
  0x17   : > { %p68_p2 = scmp.eq.s32.totalorder %s2026_s29, 0  ;;  %p73_p3 = scmp.ne.s32.totalorder %s2010_s25, %s2006_s24 }
  0x18   : > { %s2715_s9 = smov (%p53_p0, %s51_s9), 0  ;;  %p74_p5 = scmp.eq.s32.totalorder %s2114_s30, 0 }
  0x19   : > { %2670 = sst [smem:[#allocation26_spill]] %s2715_s9  ;;  %p2126_p4 = por %p68_p2, %p67_p1 }
  0x1a   : > { %s55_s12 = ssub.s32 %s2022_s28, %s2715_s9  ;;  %p267_p6 = scmp.eq.s32.totalorder %s2114_s30, 1 }
  0x1b   : > { %p58_p7 = scmp.eq.s32.totalorder %s55_s12, 0  ;;  %p2134_p8 = por %p74_p5, %p73_p3 }
  0x1c   : > { %p2138_p9 = por %p267_p6, %p67_p1  ;;  %p273_p10 = scmp.eq.s32.totalorder %s1495_s8, 1 }
  0x1d   : > { %s2672_s13 = scalar_select %p2134_p8, 1, 0 }
  0x1e   : > { %s2673_s14 = scalar_select %p2138_p9, 1, 0 }
  0x1f   : > { %s2143_s15 = scalar_select %p58_p7, %s2014_s26, %s60_s10  }
  0x20   : > { %p2145_p11 = por %p273_p10, %p73_p3  ;;  %p1649_p13 = scmp.lt.s32.totalorder %s2026_s29, 2 }
  0x21   : > { %2674 = sst [smem:[#allocation27_spill]] %s2143_s15  ;;  %s2152_s17 = sand.u32 1, %s2014_s26  }
  0x22   : > { %s2675_s16 = scalar_select %p2145_p11, 1, 0 }
  0x23   : > { %s2155_s18 = sshll.u32 %s2152_s17, 4  ;;  %s2158_s19 = sshll.u32 %s2022_s28, 8 }
  0x24   : > { %2676 = sst [smem:[#allocation28_spill]] %s2675_s16  ;;  %p2162_p0 = pnand %p1649_p13, %p2126_p4 }
  0x25   : > { %s2167_s21 = sand.u32 1, %s2026_s29   ;;  %s2678_s1 = sld [smem:[#allocation30_spill]] }
  0x26   : > { %s2677_s20 = scalar_select %p2162_p0, 1, 0 }
  0x27   : > { %s319_s10 = scalar_lea.vmem [#allocation7], %s2155_s18  ;;  %p2185_p4 = pneg %p2162_p0 }
  0x28   : > { %s327_s11 = sshll.u32 %s319_s10, 4  ;;  %s2177_s11 = int_to_ptr.vmem [resolvable:$true] %s327_s11 }
  0x2b   : > { %s2173_s8 = scalar_lea.hbm %s2678_s1, %s2158_s19  ;;  %s1727_s10 = scalar_lea.hbm %s2678_s1, 512 }
  0x2c   : > { %s1722_s9 = scalar_lea.hbm %s2173_s8, 256  ;;  %p1728_p7 = scmp.lt.u32.totalorder %s2173_s8, %s2678_s1 }
  0x2d   : > { %p1723_p3 = scmp.ne.s32.totalorder %s2173_s8, %s1722_s9  ;;  %p1729_p10 = scmp.lt.u32.totalorder %s1727_s10, %s1722_s9 }
  0x2e   : > { %p1731_p12 = scmp.lt.u32.totalorder %s1722_s9, %s2173_s8 }
  0x2f   : > { %p1725_p5 = pnand %p2185_p4, %p1723_p3  ;;  %p1730_p13 = por %p1729_p10, %p1728_p7 }
  0x31   : > { %p1726_p6 = pneg %p1725_p5  ;;  %p1732_p1 = por %p1731_p12, %p1730_p13 }
  0x33   : > { %p1733_p2 = pnand %p1732_p1, %p1726_p6 }
  0x35   : > { %1736 = shalt.err (!%p1733_p2)
}
  0x36   : > { %s1737_s12 = scalar_lea.vmem %s2177_s11, 256  ;;  %s2028_s22 = smov [#allocation7]  }
  0x37   : > { %p1738_p3 = scmp.ne.s32.totalorder %s2177_s11, %s1737_s12  ;;  %s1742_s23 = sshll.u32 %s2028_s22, 4  ;;  %s1743_s23 = int_to_ptr.vmem [resolvable:$false] %s1742_s23 }
  0x38   : > { %s1744_s26 = scalar_lea.vmem %s1743_s23, 512  ;;  %p1745_p9 = scmp.lt.s32.totalorder %s2177_s11, %s1743_s23 }
  0x39   : > { %p1740_p5 = pnand %p1738_p3, %p2185_p4  ;;  %p1746_p8 = scmp.lt.s32.totalorder %s1744_s26, %s1737_s12 }
  0x3b   : > { %p1741_p11 = pneg %p1740_p5  ;;  %p1747_p7 = por %p1746_p8, %p1745_p9 }
  0x3d   : > { %p1748_p10 = pnand %p1747_p7, %p1741_p11 }
  0x3f   : > { %1751 = shalt.err (!%p1748_p10)
}
  0x40   : > { %s2650_s9 = smov 64   ;;  %s2652_s16 = smov 4  }
  0x41   : > { %s2680_s12 = scalar_lea.sflag [#allocation8], %s2167_s21  ;;  %p2681_p8 = scmp.lt.s32.totalorder %s2026_s29, 3 }
  0x42   : > { %1629 = dma.hbm_to_vmem [thread:$0]  (!%p2162_p0), %s2173_s8, 256, %s2177_s11, %s2680_s12, %s2650_s9, %s2650_s9, %s2652_s16  }
  0x43   : > { %p2682_p9 = scmp.ge.s32.totalorder %s2026_s29, 1  ;;  %s2222_s22 = sshll.u32 %s2152_s17, 2 }
  0x44   : > { %s2225_s23 = sshll.u32 %s2022_s28, 6  ;;  %s2684_s3 = sld [smem:[#allocation31_spill]] }
  0x45   : > { %p2217_p11 = pnand %p2682_p9, %p2681_p8  ;;  %s363_s8 = scalar_lea.vmem [#allocation10], %s2222_s22 }
  0x46   : > { %s371_s11 = sshll.u32 %s363_s8, 4  ;;  %s372_s11 = int_to_ptr.vmem [resolvable:$true] %s371_s11 }
  0x47   : > { %s2683_s10 = scalar_select %p2217_p11, 1, 0 }
  0x4a   : > { %s2231_s24 = scalar_lea.hbm %s2684_s3, %s2225_s23  ;;  %s1757_s29 = scalar_lea.hbm %s2684_s3, 128 }
  0x4b   : > { %s1752_s9 = scalar_lea.hbm %s2231_s24, 64  ;;  %p1758_p6 = scmp.lt.u32.totalorder %s2231_s24, %s2684_s3 }
  0x4c   : > { %p1753_p12 = scmp.ne.s32.totalorder %s2231_s24, %s1752_s9  ;;  %p1759_p13 = scmp.lt.u32.totalorder %s1757_s29, %s1752_s9 }
  0x4d   : > { %p1761_p5 = scmp.lt.u32.totalorder %s1752_s9, %s2231_s24 }
  0x4e   : > { %p1755_p1 = pnand %p1753_p12, %p2185_p4  ;;  %p1760_p3 = por %p1759_p13, %p1758_p6 }
  0x50   : > { %p1756_p2 = pneg %p1755_p1  ;;  %p1762_p7 = por %p1761_p5, %p1760_p3 }
  0x52   : > { %p1763_p10 = pnand %p1762_p7, %p1756_p2 }
  0x54   : > { %1766 = shalt.err (!%p1763_p10)
}
  0x55   : > { %s1767_s8 = scalar_lea.vmem %s372_s11, 64  ;;  %s2031_s12 = smov [#allocation10]  }
  0x56   : > { %p1768_p8 = scmp.ne.s32.totalorder %s372_s11, %s1767_s8  ;;  %s1772_s7 = sshll.u32 %s2031_s12, 4  ;;  %s1773_s7 = int_to_ptr.vmem [resolvable:$false] %s1772_s7 }
  0x57   : > { %s1774_s28 = scalar_lea.vmem %s1773_s7, 128  ;;  %p1775_p1 = scmp.lt.s32.totalorder %s372_s11, %s1773_s7 }
  0x58   : > { %p1770_p9 = pnand %p1768_p8, %p2185_p4  ;;  %p1776_p11 = scmp.lt.s32.totalorder %s1774_s28, %s1767_s8 }
  0x5a   : > { %p1771_p12 = pneg %p1770_p9  ;;  %p1777_p0 = por %p1776_p11, %p1775_p1 }
  0x5c   : > { %p1778_p6 = pnand %p1777_p0, %p1771_p12 }
  0x5e   : > { %1781 = shalt.err (!%p1778_p6)
}
  0x5f   : > { %p2685_p13 = scmp.ne.s32.totalorder %s2677_s20, 0  ;;  %s2686_s29 = scalar_lea.sflag [#allocation11], %s2167_s21 }
  0x60   : > { %s2687_s5 = sld [smem:[#allocation32_spill]]  ;;  %s401_s7 = scalar_lea.vmem [#allocation13], %s2222_s22 }
  0x61   : > { %1635 = dma.hbm_to_vmem [thread:$0]  (!%p2685_p13), %s2231_s24, 64, %s372_s11, %s2686_s29  }
  0x62   : > { %s409_s1 = sshll.u32 %s401_s7, 4  ;;  %s410_s1 = int_to_ptr.vmem [resolvable:$true] %s409_s1 }
  0x66   : > { %s2258_s12 = scalar_lea.hbm %s2687_s5, %s2225_s23  ;;  %s1787_s11 = scalar_lea.hbm %s2687_s5, 128 }
  0x67   : > { %s1782_s8 = scalar_lea.hbm %s2258_s12, 64  ;;  %p1788_p3 = scmp.lt.u32.totalorder %s2258_s12, %s2687_s5 }
  0x68   : > { %p1783_p0 = scmp.ne.s32.totalorder %s2258_s12, %s1782_s8  ;;  %p1789_p5 = scmp.lt.u32.totalorder %s1787_s11, %s1782_s8 }
  0x69   : > { %p1791_p10 = scmp.lt.u32.totalorder %s1782_s8, %s2258_s12 }
  0x6a   : > { %p1785_p11 = pnand %p1783_p0, %p2185_p4  ;;  %p1790_p7 = por %p1789_p5, %p1788_p3 }
  0x6c   : > { %p1786_p2 = pneg %p1785_p11  ;;  %p1792_p8 = por %p1791_p10, %p1790_p7 }
  0x6e   : > { %p1793_p9 = pnand %p1792_p8, %p1786_p2 }
  0x70   : > { %1796 = shalt.err (!%p1793_p9)
}
  0x71   : > { %s1797_s16 = scalar_lea.vmem %s410_s1, 64  ;;  %s2032_s7 = smov [#allocation13]  }
  0x72   : > { %p1798_p12 = scmp.ne.s32.totalorder %s410_s1, %s1797_s16  ;;  %s1802_s26 = sshll.u32 %s2032_s7, 4  ;;  %s1803_s26 = int_to_ptr.vmem [resolvable:$false] %s1802_s26 }
  0x73   : > { %s1804_s28 = scalar_lea.vmem %s1803_s26, 128  ;;  %p1805_p0 = scmp.lt.s32.totalorder %s410_s1, %s1803_s26 }
  0x74   : > { %p1800_p1 = pnand %p1798_p12, %p2185_p4  ;;  %p1806_p11 = scmp.lt.s32.totalorder %s1804_s28, %s1797_s16 }
  0x76   : > { %p1801_p6 = pneg %p1800_p1  ;;  %p1807_p13 = por %p1806_p11, %p1805_p0 }
  0x78   : > { %p1808_p3 = pnand %p1807_p13, %p1801_p6 }
  0x7a   : > { %1811 = shalt.err (!%p1808_p3)
}
  0x7b   : > { %p2688_p5 = scmp.ne.s32.totalorder %s2677_s20, 0  ;;  %s2689_s8 = scalar_lea.sflag [#allocation14], %s2167_s21 }
  0x7c   : > { %s2690_s0 = sld [smem:[#allocation29_spill]]  ;;  %s297_s26 = scalar_lea.vmem [#allocation4], %s2155_s18 }
  0x7d   : > { %1641 = dma.hbm_to_vmem [thread:$0]  (!%p2688_p5), %s2258_s12, 64, %s410_s1, %s2689_s8  }
  0x7e   : > { %s305_s9 = sshll.u32 %s297_s26, 4  ;;  %s2294_s28 = scalar_lea.hbm %s2638_s2, %s2158_s19  ;;  %s2288_s9 = int_to_ptr.vmem [resolvable:$true] %s305_s9 }
  0x7f   : > { %s294_s3 = scalar_lea.sflag [#allocation5], %s2152_s17 }
  0x82   : > { %s2285_s29 = scalar_lea.hbm %s2690_s0, %s2158_s19  ;;  %s1817_s24 = scalar_lea.hbm %s2690_s0, 512 }
  0x83   : > { %s1812_s12 = scalar_lea.hbm %s2285_s29, 256  ;;  %p1818_p10 = scmp.lt.u32.totalorder %s2285_s29, %s2690_s0 }
  0x84   : > { %p1813_p13 = scmp.ne.s32.totalorder %s2285_s29, %s1812_s12  ;;  %p1819_p8 = scmp.lt.u32.totalorder %s1817_s24, %s1812_s12 }
  0x85   : > { %p1821_p12 = scmp.lt.u32.totalorder %s1812_s12, %s2285_s29 }
  0x86   : > { %p1815_p2 = pnand %p1813_p13, %p2185_p4  ;;  %p1820_p9 = por %p1819_p8, %p1818_p10 }
  0x88   : > { %p1816_p7 = pneg %p1815_p2  ;;  %p1822_p1 = por %p1821_p12, %p1820_p9 }
  0x8a   : > { %p1823_p6 = pnand %p1822_p1, %p1816_p7 }
  0x8c   : > { %1826 = shalt.err (!%p1823_p6)
}
  0x8d   : > { %s1827_s19 = scalar_lea.vmem %s2288_s9, 256  ;;  %s2033_s26 = smov [#allocation4]  }
  0x8e   : > { %p1828_p0 = scmp.ne.s32.totalorder %s2288_s9, %s1827_s19  ;;  %s1832_s16 = sshll.u32 %s2033_s26, 4  ;;  %s1833_s16 = int_to_ptr.vmem [resolvable:$false] %s1832_s16 }
  0x8f   : > { %s1834_s5 = scalar_lea.vmem %s1833_s16, 512  ;;  %p1835_p13 = scmp.lt.s32.totalorder %s2288_s9, %s1833_s16 }
  0x90   : > { %p1830_p11 = pnand %p1828_p0, %p2185_p4  ;;  %p1836_p2 = scmp.lt.s32.totalorder %s1834_s5, %s1827_s19 }
  0x92   : > { %p1831_p3 = pneg %p1830_p11  ;;  %p1837_p10 = por %p1836_p2, %p1835_p13 }
  0x94   : > { %p1838_p8 = pnand %p1837_p10, %p1831_p3 }
  0x96   : > { %1841 = shalt.err (!%p1838_p8)
}
  0x97   : > { %s2691_s7 = smov 4   ;;  %s2692_s12 = smov 64  }
  0x98   : > { %1626 = dma.hbm_to_vmem [thread:$0]  (!%p2688_p5), %s2285_s29, 256, %s2288_s9, %s294_s3, %s2692_s12, %s2692_s12, %s2691_s7  }
  0x99   : > { %s341_s1 = scalar_lea.vmem [#allocation9], %s2155_s18  ;;  %s2330_s19 = scalar_lea.hbm %s2640_s4, %s2225_s23 }
  0x9a   : > { %s349_s8 = sshll.u32 %s341_s1, 4  ;;  %s1842_s17 = scalar_lea.hbm %s2294_s28, 256  ;;  %s2324_s8 = int_to_ptr.vmem [resolvable:$true] %s349_s8 }
  0x9b   : > { %p1843_p7 = scmp.ne.s32.totalorder %s2294_s28, %s1842_s17  ;;  %s1847_s5 = scalar_lea.hbm %s2638_s2, 512 }
  0x9c   : > { %p1848_p1 = scmp.lt.u32.totalorder %s2294_s28, %s2638_s2  ;;  %p1849_p6 = scmp.lt.u32.totalorder %s1847_s5, %s1842_s17 }
  0x9d   : > { %p1845_p9 = pnand %p1843_p7, %p2185_p4  ;;  %p1851_p11 = scmp.lt.u32.totalorder %s1842_s17, %s2294_s28 }
  0x9e   : > { %p1850_p0 = por %p1849_p6, %p1848_p1 }
  0x9f   : > { %p1846_p12 = pneg %p1845_p9 }
  0xa0   : > { %p1852_p3 = por %p1851_p11, %p1850_p0 }
  0xa2   : > { %p1853_p13 = pnand %p1852_p3, %p1846_p12 }
  0xa4   : > { %1856 = shalt.err (!%p1853_p13)
}
  0xa5   : > { %s1857_s18 = scalar_lea.vmem %s2324_s8, 256  ;;  %s2034_s29 = smov [#allocation9]  }
  0xa6   : > { %p1858_p2 = scmp.ne.s32.totalorder %s2324_s8, %s1857_s18  ;;  %s1862_s9 = sshll.u32 %s2034_s29, 4  ;;  %s1863_s9 = int_to_ptr.vmem [resolvable:$false] %s1862_s9 }
  0xa7   : > { %s1864_s0 = scalar_lea.vmem %s1863_s9, 512  ;;  %p1865_p7 = scmp.lt.s32.totalorder %s2324_s8, %s1863_s9 }
  0xa8   : > { %p1860_p10 = pnand %p1858_p2, %p2185_p4  ;;  %p1866_p9 = scmp.lt.s32.totalorder %s1864_s0, %s1857_s18 }
  0xaa   : > { %p1861_p8 = pneg %p1860_p10  ;;  %p1867_p1 = por %p1866_p9, %p1865_p7 }
  0xac   : > { %p1868_p6 = pnand %p1867_p1, %p1861_p8 }
  0xae   : > { %1871 = shalt.err (!%p1868_p6)
}
  0xaf   : > { %s2693_s1 = scalar_lea.sflag [#allocation8], %s2167_s21  ;;  %s382_s24 = scalar_lea.vmem [#allocation12], %s2222_s22 }
  0xb0   : > { %1632 = dma.hbm_to_vmem [thread:$0]  (!%p2688_p5), %s2294_s28, 256, %s2324_s8, %s2693_s1, %s2692_s12, %s2692_s12, %s2691_s7  }
  0xb1   : > { %s390_s11 = sshll.u32 %s382_s24, 4  ;;  %s2363_s16 = scalar_lea.hbm %s2642_s6, %s2225_s23  ;;  %s391_s11 = int_to_ptr.vmem [resolvable:$true] %s390_s11 }
  0xb2   : > { %s1872_s5 = scalar_lea.hbm %s2330_s19, 64  ;;  %s1877_s29 = scalar_lea.hbm %s2640_s4, 128 }
  0xb3   : > { %p1873_p12 = scmp.ne.s32.totalorder %s2330_s19, %s1872_s5  ;;  %p1878_p3 = scmp.lt.u32.totalorder %s2330_s19, %s2640_s4 }
  0xb4   : > { %p1879_p13 = scmp.lt.u32.totalorder %s1877_s29, %s1872_s5  ;;  %p1881_p10 = scmp.lt.u32.totalorder %s1872_s5, %s2330_s19 }
  0xb5   : > { %p1875_p0 = pnand %p1873_p12, %p2185_p4 }
  0xb6   : > { %p1880_p2 = por %p1879_p13, %p1878_p3 }
  0xb7   : > { %p1876_p11 = pneg %p1875_p0 }
  0xb8   : > { %p1882_p8 = por %p1881_p10, %p1880_p2 }
  0xba   : > { %p1883_p7 = pnand %p1882_p8, %p1876_p11 }
  0xbc   : > { %1886 = shalt.err (!%p1883_p7)
}
  0xbd   : > { %s1887_s23 = scalar_lea.vmem %s391_s11, 64  ;;  %s2035_s28 = smov [#allocation12]  }
  0xbe   : > { %p1888_p9 = scmp.ne.s32.totalorder %s391_s11, %s1887_s23  ;;  %s1892_s7 = sshll.u32 %s2035_s28, 4  ;;  %s1893_s7 = int_to_ptr.vmem [resolvable:$false] %s1892_s7 }
  0xbf   : > { %s1894_s12 = scalar_lea.vmem %s1893_s7, 128  ;;  %p1895_p12 = scmp.lt.s32.totalorder %s391_s11, %s1893_s7 }
  0xc0   : > { %p1890_p1 = pnand %p1888_p9, %p2185_p4  ;;  %p1896_p0 = scmp.lt.s32.totalorder %s1894_s12, %s1887_s23 }
  0xc2   : > { %p1891_p6 = pneg %p1890_p1  ;;  %p1897_p5 = por %p1896_p0, %p1895_p12 }
  0xc4   : > { %p1898_p3 = pnand %p1897_p5, %p1891_p6 }
  0xc6   : > { %1901 = shalt.err (!%p1898_p3)
}
  0xc7   : > { %p2694_p13 = scmp.ne.s32.totalorder %s2677_s20, 0  ;;  %s2695_s8 = scalar_lea.sflag [#allocation11], %s2167_s21 }
  0xc8   : > { %s420_s1 = scalar_lea.vmem [#allocation15], %s2222_s22  ;;  %s1902_s17 = scalar_lea.hbm %s2363_s16, 64 }
  0xc9   : > { %1638 = dma.hbm_to_vmem [thread:$0]  (!%p2694_p13), %s2330_s19, 64, %s391_s11, %s2695_s8  }
  0xca   : > { %s428_s24 = sshll.u32 %s420_s1, 4  ;;  %p1903_p11 = scmp.ne.s32.totalorder %s2363_s16, %s1902_s17  ;;  %s429_s24 = int_to_ptr.vmem [resolvable:$true] %s428_s24 }
  0xcb   : > { %s1907_s3 = scalar_lea.hbm %s2642_s6, 128  ;;  %p1908_p10 = scmp.lt.u32.totalorder %s2363_s16, %s2642_s6 }
  0xcc   : > { %p1905_p5 = pnand %p1903_p11, %p2185_p4  ;;  %p1909_p8 = scmp.lt.u32.totalorder %s1907_s3, %s1902_s17 }
  0xcd   : > { %p1911_p9 = scmp.lt.u32.totalorder %s1902_s17, %s2363_s16 }
  0xce   : > { %p1906_p2 = pneg %p1905_p5  ;;  %p1910_p7 = por %p1909_p8, %p1908_p10 }
  0xd0   : > { %p1912_p1 = por %p1911_p9, %p1910_p7 }
  0xd2   : > { %p1913_p6 = pnand %p1912_p1, %p1906_p2 }
  0xd4   : > { %1916 = shalt.err (!%p1913_p6)
}
  0xd5   : > { %s1917_s22 = scalar_lea.vmem %s429_s24, 64  ;;  %s2036_s19 = smov [#allocation15]  }
  0xd6   : > { %p1918_p12 = scmp.ne.s32.totalorder %s429_s24, %s1917_s22  ;;  %s1922_s11 = sshll.u32 %s2036_s19, 4  ;;  %s1923_s11 = int_to_ptr.vmem [resolvable:$false] %s1922_s11 }
  0xd7   : > { %s1924_s9 = scalar_lea.vmem %s1923_s11, 128  ;;  %p1925_p11 = scmp.lt.s32.totalorder %s429_s24, %s1923_s11 }
  0xd8   : > { %p1920_p0 = pnand %p1918_p12, %p2185_p4  ;;  %p1926_p5 = scmp.lt.s32.totalorder %s1924_s9, %s1917_s22 }
  0xda   : > { %p1921_p3 = pneg %p1920_p0  ;;  %p1927_p13 = por %p1926_p5, %p1925_p11 }
  0xdc   : > { %p1928_p8 = pnand %p1927_p13, %p1921_p3 }
  0xde   : > { %1931 = shalt.err (!%p1928_p8)
}
  0xdf   : > { %p2696_p10 = scmp.ne.s32.totalorder %s2677_s20, 0  ;;  %s2697_s0 = scalar_lea.sflag [#allocation14], %s2167_s21 }
  0xe0   : > { %p2698_p2 = scmp.ne.s32.totalorder %s2683_s10, 0 }
  0xe1   : > { %1644 = dma.hbm_to_vmem [thread:$0]  (!%p2696_p10), %s2363_s16, 64, %s429_s24, %s2697_s0  }
  0xe2   : > { %437 = sbr.rel (%p2698_p2) target bundleno = 792 (0x318), region = 48  ;;  %s2407_s15 = sand.u32 (!%p2698_p2), 1, %s2010_s25  }
  0xe3   : > { %s2410_s23 = sshll.u32 (!%p2698_p2), %s2407_s15, 4  ;;  %s440_s28 = scalar_lea.sflag (!%p2698_p2), [#allocation5], %s2407_s15 }
  0xe4   : > { %s2414_s7 = scalar_lea.vmem (!%p2698_p2), [#allocation4], %s2410_s23  ;;  %p2699_p4 = scmp.ne.s32.totalorder (!%p2698_p2), %s2672_s13, 0 }
  0xe9   : > { %1985 = dma.done.wait (%p2699_p4), %s440_s28, 256  }
  0xea   : > { %1987 = vsyncadd (%p2699_p4), %s440_s28, 4294967040  ;;  %s448_s20 = sand.u32 1, %s2114_s30   ;;  %s2422_s10 = scalar_lea.vmem [#allocation7], %s2410_s23 }
  0xeb   : > { %s449_s21 = scalar_lea.sflag [#allocation8], %s448_s20 }
  0xec   : > { %1989 = dma.done.wait (%p2699_p4), %s449_s21, 512  }
  0xed   : > { %1991 = vsyncadd (%p2699_p4), %s449_s21, 4294966784  ;;  %s2429_s16 = sshll.u32 %s2407_s15, 2  ;;  %s2432_s12 = scalar_lea.vmem [#allocation9], %s2410_s23 }
  0xee   : > { %s467_s8 = scalar_lea.sflag [#allocation11], %s448_s20  ;;  %s470_s1 = scalar_lea.vmem [#allocation10], %s2429_s16 }
  0xef   : > { %1993 = dma.done.wait (%p2699_p4), %s467_s8, 128  }
  0xf0   : > { %1995 = vsyncadd (%p2699_p4), %s467_s8, 4294967168  ;;  %s479_s30 = scalar_lea.vmem [#allocation12], %s2429_s16  ;;  %s485_s24 = scalar_lea.sflag [#allocation14], %s448_s20 }
  0xf1   : > { %s488_s17 = scalar_lea.vmem [#allocation13], %s2429_s16 }
  0xf2   : > { %1997 = dma.done.wait (%p2699_p4), %s485_s24, 128  }
  0xf3   : > { %1999 = vsyncadd (%p2699_p4), %s485_s24, 4294967168  ;;  %vm563_vm0 = vcmask 64512   ;;  %v772_v0 = vlaneseq  ;;  %v2037_v1 = vmov 0.0   ;;  %vm2038_vm1 = vmmov 0   ;;  %v574_v3 = vld [vmem:[%s2422_s10] sm:$0xf] }
  0xf4   : > { %1559 = vmatprep.subr.bf16.mxu0 %v2037_v1  ;;  %1565 = vmatprep.subr.bf16.mxu1 %v2037_v1  ;;  %564 = vst.msk [vmem:[#allocation2] sm:$0xff] %vm563_vm0, %v2037_v1  ;;  %565 = vst.msk [vmem:[#allocation2 + $0x8] sm:$0xff] %vm563_vm0, %v2037_v1  ;;  %v575_v4 = vld [vmem:[%s2422_s10 + $0x4] sm:$0xf]  ;;  %v587_v6 = vsel %vm563_vm0, %v574_v3, 0  ;;  %vm1008_vm2 = vcmask 1043456  }
  0xf5   : > { %566 = vst.msk [vmem:[#allocation2 + $0x10] sm:$0xff] %vm563_vm0, %v2037_v1  ;;  %567 = vst.msk [vmem:[#allocation2 + $0x18] sm:$0xff] %vm563_vm0, %v2037_v1  ;;  %1561 = vmatprep.mubr.msk.bf16.mxu0 %vm2038_vm1, %v2037_v1  ;;  %1567 = vmatprep.mubr.msk.bf16.mxu1 %vm2038_vm1, %v2037_v1  ;;  %v2460_v2 = vshrl.u32 %v772_v0, 7  ;;  %v633_v7 = vsel %vm563_vm0, %v575_v4, 0  ;;  %v767_v8 = vld [vmem:[%s470_s1] sm:$0xf] }
  0xf6   : > { %1560 = vmatpush3.bf16.xpose.msra.mxu0 %v587_v6  ;;  %1566 = vmatpush3.bf16.xpose.msra.mxu1 %v633_v7  ;;  %v576_v10 = vld [vmem:[%s2422_s10 + $0x8] sm:$0xf]  ;;  %v577_v11 = vld [vmem:[%s2422_s10 + $0xc] sm:$0xf]  ;;  %v570_v15 = vld [vmem:[%s2414_s7] sm:$0xf] }
  0xf7   : > { %v2465_v5 = vsub.s32 0, %v2460_v2  ;;  %1571 = vmatprep.subr.bf16.mxu0 %v2037_v1  ;;  %1577 = vmatprep.subr.bf16.mxu1 %v2037_v1  ;;  %v2472_v9 = vsub.s32 1, %v2460_v2  ;;  %v768_v13 = vld [vmem:[%s479_s30] sm:$0xf]  ;;  %v571_v16 = vld [vmem:[%s2414_s7 + $0x4] sm:$0xf] }
  0xf8   : > { %v679_v17 = vsel %vm563_vm0, %v576_v10, 0  ;;  %v725_v18 = vsel %vm563_vm0, %v577_v11, 0  ;;  %v2487_v21 = vsub.s32 2, %v2460_v2  ;;  %v2490_v22 = vsub.s32 3, %v2460_v2  ;;  %v572_v25 = vld [vmem:[%s2414_s7 + $0x8] sm:$0xf] }
  0xf9   : > { %v785_v12 = vrot.slane %v767_v8, %v2465_v5  ;;  %v887_v14 = vrot.slane %v768_v13, %v2465_v5  ;;  %v792_v19 = vrot.slane %v767_v8, %v2472_v9  ;;  %v894_v20 = vrot.slane %v768_v13, %v2472_v9  ;;  %v573_v26 = vld [vmem:[%s2414_s7 + $0xc] sm:$0xf]  ;;  %v578_v29 = vld [vmem:[%s2432_s12] sm:$0xf]  ;;  %v579_v30 = vld [vmem:[%s2432_s12 + $0x4] sm:$0xf] }
  0xfa   : > { %v799_v23 = vrot.slane %v767_v8, %v2487_v21  ;;  %v806_v24 = vrot.slane %v767_v8, %v2490_v22  ;;  %v901_v27 = vrot.slane %v768_v13, %v2487_v21  ;;  %v908_v28 = vrot.slane %v768_v13, %v2490_v22  ;;  %v1528_v35 = vld.sshfl [vmem:[%s488_s17] sm:$0x33 pattern:$0x75316420]  ;;  %s497_s13 = scalar_lea.vmem [#allocation15], %s2429_s16  ;;  %s557_s26 = scalar_lea.vmem [#allocation16], %s2410_s23 }
  0xfb   : > { %787 = vbcast.lane.b32.xlu0 %v785_v12, 256  ;;  %889 = vbcast.lane.b32.xlu1 %v887_v14, 256  ;;  %v1010_v31 = vsel %vm1008_vm2, %v578_v29, 0  ;;  %v1056_v32 = vsel %vm1008_vm2, %v579_v30, 0  ;;  %v2039_v33 = vmov 1966171168   ;;  %v818_v39 = vcombine.high %v1528_v35, %v1528_v35 }
  0xfc   : > { %v820_v34 = vunpack.c.l.s4 %v2039_v33  ;;  %v1529_v37 = vld.sshfl [vmem:[%s497_s13] sm:$0x33 pattern:$0x75316420]  ;;  %v2527_v53 = vand.u32 127, %v772_v0  ;;  %vm568_vm4 = vcmask 60416  }
  0xfd   : > { %1562 = vmatmul.mubr.msk.bf16.vlgmr.msra.gmra.mrb[0].mxu0 %vm563_vm0, %v570_v15  ;;  %1568 = vmatmul.mubr.msk.bf16.vlgmr.msra.gmra.mrb[0].mxu1 %vm563_vm0, %v571_v16  ;;  %v867_v40 = vcombine.high %v1529_v37, %v1529_v37  ;;  %569 = vst.msk [vmem:[#allocation3] sm:$0xf] %vm568_vm4, %v2037_v1  ;;  %vm987_vm5 = vcmask 1041409   ;;  %vm989_vm6 = vcmask 1042434   ;;  %vm991_vm7 = vcmask 1043459   ;;  %s1542_s5 = sshll.u32 %s2018_s27, 8 }
  0xfe   : > { %1572 = vmatpush3.bf16.xpose.msra.mxu0 %v679_v17  ;;  %1578 = vmatpush3.bf16.xpose.msra.mxu1 %v725_v18  ;;  %v821_v36 = vunpack.c.0.s8 %v820_v34  ;;  %vm781_vm3 = vcmp.le.s32.totalorder %v2527_v53, %v2460_v2  ;;  %s1269_s3 = sshll.u32 %s557_s26, 4  ;;  %s2700_s22 = sld [smem:[#allocation33_spill]]  ;;  %s2586_s3 = int_to_ptr.vmem [resolvable:$true] %s1269_s3 }
  0xff   : > { %1573 = vmatprep.mubr.msk.bf16.mxu0 %vm2038_vm1, %v2037_v1  ;;  %1579 = vmatprep.mubr.msk.bf16.mxu1 %vm2038_vm1, %v2037_v1  ;;  %s1255_s27 = scalar_lea.sflag [#allocation6], %s2407_s15  ;;  %s1932_s11 = scalar_lea.vmem %s2586_s3, 256 }
 0x100   : > { %794 = vbcast.lane.b32.xlu0 %v792_v19, 256  ;;  %896 = vbcast.lane.b32.xlu1 %v894_v20, 256  ;;  %v824_v42 = vsub.s32 %v821_v36, %v2460_v2  ;;  %p1933_p13 = scmp.ne.s32.totalorder %s2586_s3, %s1932_s11  ;;  %p2701_p7 = scmp.ne.s32.totalorder %s2673_s14, 0 }
 0x101   : > { %1583 = vmatprep.subr.bf16.mxu0 %v2037_v1  ;;  %1589 = vmatprep.subr.bf16.mxu1 %v2037_v1  ;;  %s2040_s9 = smov [#allocation16]  }
 0x102   : > { %v832_v43 = vrot.slane %v818_v39, %v824_v42  ;;  %v881_v44 = vrot.slane %v867_v40, %v824_v42  ;;  %v825_v46 = vrot.slane %v1528_v35, %v824_v42  ;;  %v874_v47 = vrot.slane %v1529_v37, %v824_v42  ;;  %p1934_p9 = pnand %p1933_p13, %p2701_p7  ;;  %s1936_s0 = sshll.u32 %s2040_s9, 4  ;;  %s1937_s0 = int_to_ptr.vmem [resolvable:$false] %s1936_s0 }
 0x103   : > { %s1938_s23 = scalar_lea.vmem %s1937_s0, 512  ;;  %p1939_p6 = scmp.lt.s32.totalorder %s2586_s3, %s1937_s0 }
 0x104   : > { %801 = vbcast.lane.b32.xlu0 %v799_v23, 256  ;;  %808 = vbcast.lane.b32.xlu1 %v806_v24, 256  ;;  %v842_v49 = vrot.slane %v832_v43, %v2465_v5  ;;  %v919_v50 = vrot.slane %v881_v44, %v2465_v5  ;;  %v838_v51 = vrot.slane %v825_v46, %v2465_v5  ;;  %s2584_s19 = scalar_lea.hbm %s2700_s22, %s1542_s5  ;;  %p1935_p1 = pneg %p1934_p9 }
 0x105   : > { %1574 = vmatmul.mubr.msk.bf16.vlgmr.msra.gmra.mrb[4].mxu0 %vm563_vm0, %v572_v25  ;;  %1580 = vmatmul.mubr.msk.bf16.vlgmr.msra.gmra.mrb[4].mxu1 %vm563_vm0, %v573_v26  ;;  %v915_v52 = vrot.slane %v874_v47, %v2465_v5  ;;  %v834_v57 = vcombine.high %v832_v43, %v832_v43  ;;  %v883_v58 = vcombine.high %v881_v44, %v881_v44  ;;  %v580_v25 = vld [vmem:[%s2432_s12 + $0x8] sm:$0xf]  ;;  %v581_v26 = vld [vmem:[%s2432_s12 + $0xc] sm:$0xf]  ;;  %p1940_p12 = scmp.lt.s32.totalorder %s1938_s23, %s1932_s11 }
 0x106   : > { %1591 = vmatprep.mubr.msk.bf16.mxu1 %vm2038_vm1, %v2037_v1  ;;  %1585 = vmatprep.mubr.msk.bf16.mxu0 %vm2038_vm1, %v2037_v1  ;;  %v833_v62 = vcombine.high %v825_v46, %v825_v46  ;;  %v882_v63 = vcombine.high %v874_v47, %v874_v47  ;;  %v1102_v36 = vsel %vm1008_vm2, %v580_v25, 0  ;;  %v1148_v37 = vsel %vm1008_vm2, %v581_v26, 0 }
 0x107   : > { %1584 = vmatpush3.bf16.msra.mxu0 %v1010_v31  ;;  %1590 = vmatpush3.bf16.msra.mxu1 %v1056_v32  ;;  %v850_v0 = vrot.slane %v834_v57, %v2465_v5  ;;  %v927_v4 = vrot.slane %v883_v58, %v2465_v5  ;;  %p1941_p0 = por %p1940_p12, %p1939_p6 }
 0x108   : > { %903 = vbcast.lane.b32.xlu0 %v901_v27, 256  ;;  %910 = vbcast.lane.b32.xlu1 %v908_v28, 256  ;;  %v846_v8 = vrot.slane %v833_v62, %v2465_v5  ;;  %v923_v10 = vrot.slane %v882_v63, %v2465_v5  ;;  %v973_v62 = vsub.s32 %v2527_v53, %v2460_v2 }
 0x109   : > { %1595 = vmatprep.subr.bf16.mxu0 %v2037_v1  ;;  %1601 = vmatprep.subr.bf16.mxu1 %v2037_v1  ;;  %p1942_p3 = pnand %p1941_p0, %p1935_p1 }
 0x16d   : > { %v890_v38 = vpop.permute.xlu1 %889  ;;  %v788_v41 = vpop.permute.xlu0 %787 }
 0x16e   : > { %v855_v60 = vsub.f32 %v788_v41, %v838_v51  ;;  %v932_v61 = vsub.f32 %v915_v52, %v890_v38 }
 0x170   : > { %v938_v7 = vsel %vm781_vm3, %v855_v60, %v932_v61 }
 0x171   : > { %v942_v15 = vmul.f32 1.442695, %v938_v7 }
 0x172   : > { %v897_v45 = vpop.permute.xlu1 %896  ;;  %v795_v48 = vpop.permute.xlu0 %794 }
 0x173   : > { %v856_v55 = vsub.f32 %v795_v48, %v842_v49  ;;  %v933_v56 = vsub.f32 %v919_v50, %v897_v45 }
 0x175   : > { %v939_v3 = vsel %vm781_vm3, %v856_v55, %v933_v56 }
 0x176   : > { %v809_v54 = vpop.permute.xlu1 %808  ;;  %v802_v59 = vpop.permute.xlu0 %801  ;;  %v944_v11 = vmul.f32 1.442695, %v939_v3 }
 0x177   : > { %v858_v13 = vsub.f32 %v809_v54, %v850_v0  ;;  %v857_v16 = vsub.f32 %v802_v59, %v846_v8 }
 0x178   : > { %1706 = vpow2.f32 %v944_v11 }
 0x179   : > { %1708 = vpow2.f32 %v942_v15 }
 0x17a   : > { %v911_v6 = vpop.permute.xlu1 %910  ;;  %v904_v12 = vpop.permute.xlu0 %903 }
 0x17b   : > { %v935_v14 = vsub.f32 %v927_v4, %v911_v6  ;;  %v934_v17 = vsub.f32 %v923_v10, %v904_v12  ;;  %v954_v10 = vld [vmem:[#allocation3] sm:$0xf] }
 0x17d   : > { %v941_v18 = vsel %vm781_vm3, %v858_v13, %v935_v14  ;;  %v940_v19 = vsel %vm781_vm3, %v857_v16, %v934_v17  ;;  %v997_v17 = vld [vmem:[#allocation2] sm:$0xff] }
 0x17e   : > { %v948_v20 = vmul.f32 1.442695, %v941_v18  ;;  %v946_v23 = vmul.f32 1.442695, %v940_v19  ;;  %v998_v18 = vld [vmem:[#allocation2 + $0x8] sm:$0xff] }
 0x180   : > { %1710 = vpow2.f32 %v948_v20 }
 0x181   : > { %1712 = vpow2.f32 %v946_v23 }
 0x182   : > { %v1707_v24 = vpop.eup %1706 }
 0x183   : > { %v1709_v27 = vpop.eup %1708 }
 0x18a   : > { %v1711_v44 = vpop.eup %1710 }
 0x18b   : > { %v1713_v45 = vpop.eup %1712 }
 0x1d0   : > { %v623_v28 = vpop.f32.mrb[0].mxu0  ;;  %v669_v29 = vpop.f32.mrb[0].mxu1 }
 0x1d1   : > { %v950_v30 = vmul.f32 %v1709_v27, %v623_v28  ;;  %v951_v31 = vmul.f32 %v1707_v24, %v669_v29  ;;  %v1563_v32 = vpop.f32.mrb[1].mxu0  ;;  %v1569_v33 = vpop.f32.mrb[1].mxu1  ;;  %v999_v28 = vld [vmem:[#allocation2 + $0x10] sm:$0xff]  ;;  %v1000_v29 = vld [vmem:[#allocation2 + $0x18] sm:$0xff] }
 0x1d2   : > { %v626_v34 = vpop.f32.mrb[2].mxu0  ;;  %v672_v35 = vpop.f32.mrb[2].mxu1 }
 0x1d3   : > { %v1001_v38 = vpack.c.bf16 %v950_v30, %v950_v30  ;;  %v1002_v39 = vpack.c.bf16 %v951_v31, %v951_v31  ;;  %v1564_v40 = vpop.f32.mrb[3].mxu0  ;;  %v958_v41 = vsel %vm563_vm0, %v951_v31, 0.0  ;;  %v955_v42 = vsel %vm563_vm0, %v950_v30, 0.0  ;;  %v1570_v43 = vpop.f32.mrb[3].mxu1 }
 0x1d4   : > { %959 = vadd.xlane.f32.xlu1 %v958_v41  ;;  %956 = vadd.xlane.f32.xlu0 %v955_v42 }
 0x1d5   : > { %1586 = vmatmul.mubr.msk.bf16.vlgmr.msra.gmra.mrb[8].mxu0 %vm563_vm0, %v1001_v38  ;;  %1592 = vmatmul.mubr.msk.bf16.vlgmr.msra.gmra.mrb[8].mxu1 %vm563_vm0, %v1002_v39 }
 0x1d6   : > { %1596 = vmatpush3.bf16.msra.mxu0 %v1102_v36  ;;  %1602 = vmatpush3.bf16.msra.mxu1 %v1148_v37 }
 0x1d7   : > { %1597 = vmatprep.mubr.msk.bf16.mxu0 %vm2038_vm1, %v2037_v1  ;;  %1603 = vmatprep.mubr.msk.bf16.mxu1 %vm2038_vm1, %v2037_v1 }
 0x1d8   : > { %v715_v46 = vpop.f32.mrb[4].mxu0  ;;  %v761_v47 = vpop.f32.mrb[4].mxu1 }
 0x1d9   : > { %v952_v48 = vmul.f32 %v1713_v45, %v715_v46  ;;  %v953_v49 = vmul.f32 %v1711_v44, %v761_v47  ;;  %v1575_v50 = vpop.f32.mrb[5].mxu0  ;;  %v1581_v51 = vpop.f32.mrb[5].mxu1 }
 0x1da   : > { %v718_v52 = vpop.f32.mrb[6].mxu0  ;;  %v764_v54 = vpop.f32.mrb[6].mxu1 }
 0x1db   : > { %v1003_v55 = vpack.c.bf16 %v952_v48, %v952_v48  ;;  %v1004_v56 = vpack.c.bf16 %v953_v49, %v953_v49  ;;  %v1576_v57 = vpop.f32.mrb[7].mxu0  ;;  %v961_v58 = vsel %vm563_vm0, %v952_v48, 0.0  ;;  %v1582_v59 = vpop.f32.mrb[7].mxu1  ;;  %v964_v60 = vsel %vm563_vm0, %v953_v49, 0.0 }
 0x1dc   : > { %962 = vadd.xlane.f32.xlu0 %v961_v58 }
 0x1dd   : > { %1598 = vmatmul.mubr.msk.bf16.vlgmr.msra.gmra.mrb[12].mxu0 %vm563_vm0, %v1003_v55  ;;  %1604 = vmatmul.mubr.msk.bf16.vlgmr.msra.gmra.mrb[12].mxu1 %vm563_vm0, %v1004_v56 }
 0x1e0   : > { %965 = vadd.xlane.f32.xlu0 %v964_v60 }
 0x261   : > { %v957_v61 = vpop.xlane.xlu0 %956  ;;  %v960_v63 = vpop.xlane.xlu1 %959 }
 0x262   : > { %v978_v0 = vrot.slane %v960_v63, %v973_v62  ;;  %v974_v4 = vrot.slane %v957_v61, %v973_v62 }
 0x264   : > { %v988_v8 = vsel %vm987_vm5, %v978_v0, %v974_v4 }
 0x269   : > { %v963_v3 = vpop.xlane.xlu0 %962 }
 0x26a   : > { %v982_v6 = vrot.slane %v963_v3, %v973_v62 }
 0x26c   : > { %v990_v12 = vsel %vm989_vm6, %v982_v6, %v988_v8 }
 0x26d   : > { %v966_v7 = vpop.xlane.xlu0 %965 }
 0x26e   : > { %v986_v11 = vrot.slane %v966_v7, %v973_v62 }
 0x270   : > { %v992_v13 = vsel %vm991_vm7, %v986_v11, %v990_v12 }
 0x271   : > { %v994_v14 = vadd.f32 %v992_v13, %v954_v10 }
 0x273   : > { %996 = vst.msk [vmem:[#allocation3] sm:$0xf] %vm568_vm4, %v994_v14 }
 0x27a   : > { %v1205_v1 = vld [vmem:[#allocation3] sm:$0xf] }
 0x27b   : > { %v1216_v2 = vrot.slane %v1205_v1, %v2472_v9  ;;  %v1209_v53 = vrot.slane %v1205_v1, %v2465_v5  ;;  %v1223_v15 = vrot.slane %v1205_v1, %v2487_v21  ;;  %v1230_v16 = vrot.slane %v1205_v1, %v2490_v22 }
 0x27d   : > { %1218 = vbcast.lane.b32.xlu0 %v1216_v2, 256  ;;  %1211 = vbcast.lane.b32.xlu1 %v1209_v53, 256 }
 0x281   : > { %1225 = vbcast.lane.b32.xlu1 %v1223_v15, 256 }
 0x285   : > { %1232 = vbcast.lane.b32.xlu1 %v1230_v16, 256 }
 0x2a8   : > { %v1046_v19 = vpop.f32.mrb[8].mxu0  ;;  %v1092_v20 = vpop.f32.mrb[8].mxu1 }
 0x2a9   : > { %v1190_v23 = vadd.f32 %v1046_v19, %v997_v17  ;;  %v1191_v24 = vadd.f32 %v1092_v20, %v998_v18  ;;  %v1587_v25 = vpop.f32.mrb[9].mxu0  ;;  %v1593_v26 = vpop.f32.mrb[9].mxu1 }
 0x2aa   : > { %v1049_v27 = vpop.f32.mrb[10].mxu0  ;;  %v1095_v9 = vpop.f32.mrb[10].mxu1 }
 0x2ab   : > { %1194 = vst.msk [vmem:[#allocation2] sm:$0xff] %vm563_vm0, %v1190_v23  ;;  %1195 = vst.msk [vmem:[#allocation2 + $0x8] sm:$0xff] %vm563_vm0, %v1191_v24  ;;  %v1588_v5 = vpop.f32.mrb[11].mxu0  ;;  %v1594_v21 = vpop.f32.mrb[11].mxu1 }
 0x2b0   : > { %v1138_v22 = vpop.f32.mrb[12].mxu0  ;;  %v1184_v30 = vpop.f32.mrb[12].mxu1 }
 0x2b1   : > { %v1192_v31 = vadd.f32 %v1138_v22, %v999_v28  ;;  %v1193_v32 = vadd.f32 %v1184_v30, %v1000_v29  ;;  %v1599_v33 = vpop.f32.mrb[13].mxu0  ;;  %v1605_v34 = vpop.f32.mrb[13].mxu1 }
 0x2b2   : > { %v1141_v35 = vpop.f32.mrb[14].mxu0  ;;  %v1187_v36 = vpop.f32.mrb[14].mxu1  ;;  %v1202_v48 = vld [vmem:[#allocation2 + $0x8] sm:$0xff]  ;;  %v1201_v51 = vld [vmem:[#allocation2] sm:$0xff] }
 0x2b3   : > { %1196 = vst.msk [vmem:[#allocation2 + $0x10] sm:$0xff] %vm563_vm0, %v1192_v31  ;;  %1197 = vst.msk [vmem:[#allocation2 + $0x18] sm:$0xff] %vm563_vm0, %v1193_v32  ;;  %v1600_v37 = vpop.f32.mrb[15].mxu0  ;;  %v1606_v38 = vpop.f32.mrb[15].mxu1 }
 0x2ba   : > { %v1203_v57 = vld [vmem:[#allocation2 + $0x10] sm:$0xff]  ;;  %v1204_v61 = vld [vmem:[#allocation2 + $0x18] sm:$0xff] }
 0x2ef   : > { %v1219_v39 = vpop.permute.xlu0 %1218  ;;  %v1212_v40 = vpop.permute.xlu1 %1211 }
 0x2f0   : > { %v1235_v41 = vadd.f32 1e-06, %v1219_v39  ;;  %v1234_v42 = vadd.f32 1e-06, %v1212_v40 }
 0x2f2   : > { %1714 = vrcp.f32 %v1235_v41 }
 0x2f3   : > { %1716 = vrcp.f32 %v1234_v42  ;;  %v1226_v43 = vpop.permute.xlu1 %1225 }
 0x2f4   : > { %v1236_v44 = vadd.f32 1e-06, %v1226_v43 }
 0x2f6   : > { %1718 = vrcp.f32 %v1236_v44 }
 0x2f7   : > { %v1233_v45 = vpop.permute.xlu1 %1232 }
 0x2f8   : > { %v1237_v46 = vadd.f32 1e-06, %v1233_v45 }
 0x2fa   : > { %1720 = vrcp.f32 %v1237_v46 }
 0x2fc   : > { %v1715_v47 = vpop.eup %1714 }
 0x2fd   : > { %v1717_v49 = vpop.eup %1716  ;;  %v1241_v50 = vmul.f32 %v1715_v47, %v1202_v48 }
 0x2fe   : > { %v1239_v52 = vmul.f32 %v1717_v49, %v1201_v51 }
 0x2ff   : > { %v1247_v54 = vpack.c.bf16 %v1241_v50, %v1241_v50 }
 0x300   : > { %v1719_v55 = vpop.eup %1718  ;;  %v1246_v56 = vpack.c.bf16 %v1239_v52, %v1239_v52 }
 0x301   : > { %1251 = vst.msk [vmem:[%s557_s26 + $0x4] sm:$0xf] %vm568_vm4, %v1247_v54  ;;  %v1243_v58 = vmul.f32 %v1719_v55, %v1203_v57 }
 0x302   : > { %1250 = vst.msk [vmem:[%s557_s26] sm:$0xf] %vm568_vm4, %v1246_v56 }
 0x303   : > { %v1248_v59 = vpack.c.bf16 %v1243_v58, %v1243_v58 }
 0x304   : > { %v1721_v60 = vpop.eup %1720 }
 0x305   : > { %1252 = vst.msk [vmem:[%s557_s26 + $0x8] sm:$0xf] %vm568_vm4, %v1248_v59  ;;  %v1245_v62 = vmul.f32 %v1721_v60, %v1204_v61 }
 0x307   : > { %v1249_v63 = vpack.c.bf16 %v1245_v62, %v1245_v62 }
 0x309   : > { %1253 = vst.msk [vmem:[%s557_s26 + $0xc] sm:$0xf] %vm568_vm4, %v1249_v63 }
 0x30a   : > { %1945 = shalt.err (!%p1942_p3)
}
 0x30b   : > { %s1946_s28 = scalar_lea.hbm %s2584_s19, 256  ;;  %s1950_s21 = scalar_lea.hbm %s2700_s22, 512 }
 0x30c   : > { %p1947_p11 = scmp.ne.s32.totalorder %s2584_s19, %s1946_s28  ;;  %p1951_p10 = scmp.lt.u32.totalorder %s2584_s19, %s2700_s22 }
 0x30d   : > { %p1952_p2 = scmp.lt.u32.totalorder %s1950_s21, %s1946_s28  ;;  %p1954_p13 = scmp.lt.u32.totalorder %s1946_s28, %s2584_s19 }
 0x30e   : > { %p1948_p5 = pnand %p1947_p11, %p2701_p7 }
 0x30f   : > { %p1953_p4 = por %p1952_p2, %p1951_p10 }
 0x310   : > { %p1949_p8 = pneg %p1948_p5 }
 0x311   : > { %p1955_p9 = por %p1954_p13, %p1953_p4 }
 0x313   : > { %p1956_p1 = pnand %p1955_p9, %p1949_p8 }
 0x315   : > { %1959 = shalt.err (!%p1956_p1)
}
 0x316   : > { %s2041_s12 = smov 64   ;;  %s2042_s8 = smov 4  }
 0x317   : > { %1621 = dma.vmem_to_hbm [thread:$0]  (%p2701_p7), %s2586_s3, 256, %s2584_s19, %s1255_s27, %s2041_s12, %s2041_s12, %s2042_s8  }
 0x318 PF: > { %s2702_s1 = sld [smem:[#allocation22_spill]]  ;;  %s2703_s30 = sld [smem:[#allocation28_spill]] }
 0x319   : > { %s2704_s24 = sld [smem:[#allocation25_spill]] }
 0x31e   : > { %s1284_s17 = sand.u32 1, %s2702_s1   ;;  %p2705_p6 = scmp.ne.s32.totalorder %s2703_s30, 0 }
 0x31f   : > { %p2706_p12 = scmp.ge.s32.totalorder %s2704_s24, 2  ;;  %s1285_s13 = scalar_lea.sflag [#allocation6], %s1284_s17 }
 0x321   : > { %p1646_p0 = pnand %p2706_p12, %p2705_p6 }
 0x323   : > { %2001 = dma.done.wait (!%p1646_p0), %s1285_s13, 256  }
 0x324   : > { %2003 = vsyncadd (!%p1646_p0), %s1285_s13, 4294967040  ;;  %s32_s29 = sadd.s32 1, %s2704_s24   ;;  %s2707_s26 = sld [smem:[#allocation23_spill]] }
 0x325   : > { %p29_p3 = scmp.ge.s32.totalorder %s32_s29, 4   ;;  %s2708_s5 = sld [smem:[#allocation27_spill]] }
 0x326   : > { %s2709_s27 = sld [smem:[#allocation24_spill]]  ;;  %s2710_s28 = sld [smem:[#allocation26_spill]] }
 0x327   : > { %s2711_s24 = smov %s2010_s25  ;;  %31 = sbr.rel (!%p29_p3) target bundleno = 18 (0x12), region = 173 }
 0x32a   : > { %s2712_s25 = smov %s2707_s26 }
 0x32b   : > { %s2713_s26 = smov %s2708_s5 }
 0x32e   :  { %1290 = vsyncpa [#allocation5], 1 }
 0x32f   :  { %1292 = vsyncpa [#allocation5 + $0x1], 1 }
 0x330   :  { %1293 = vsyncpa [#allocation8], 1 }
 0x331   :  { %1295 = vsyncpa [#allocation8 + $0x1], 1 }
 0x332   :  { %1296 = vsyncpa [#allocation11], 1 }
 0x333   :  { %1298 = vsyncpa [#allocation11 + $0x1], 1 }
 0x334   :  { %1299 = vsyncpa [#allocation14], 1 }
 0x335   :  { %1301 = vsyncpa [#allocation14 + $0x1], 1 }
 0x336   :  { %1302 = vsyncpa [#allocation6], 1 }
 0x337   :  { %1304 = vsyncpa [#allocation6 + $0x1], 1 }

// kernel: lion_block.8
= control target key start
LH: loop header
LB: loop body
LE: loop exit
PB: predicated region body
PF: predicated region fallthrough
CT: control target
= control target key end

     0   :  { %10 = vsyncpa [#allocation4], 0  ;;  %s567_s0 = inlined_call_operand.hbm [shape: f32[16,32], index: 0, kind: input, shape index: {}]   ;;  %s568_s1 = inlined_call_operand.hbm [shape: f32[1,32], index: 1, kind: input, shape index: {}]   ;;  %s569_s2 = inlined_call_operand.hbm [shape: f32[1,32], index: 2, kind: input, shape index: {}]   ;;  %s570_s3 = inlined_call_operand.hbm [shape: bf16[32,128], index: 3, kind: input, shape index: {}]   ;;  %s571_s4 = inlined_call_operand.hbm [shape: f32[1,128], index: 4, kind: input, shape index: {}]   ;;  %s572_s5 = inlined_call_operand.hbm [shape: bf16[16,128], index: 5, kind: output, shape index: {}]  }
   0x1   :  { %11 = vsyncpa [#allocation7], 0 }
   0x2   :  { %12 = vsyncpa [#allocation10], 0 }
   0x3   :  { %13 = vsyncpa [#allocation5], 0  ;;  %s434_s18 = smov [#allocation6]   ;;  %s435_s20 = smov [#allocation9]  }
   0x4   :  { %s32_s19 = sshll.u32 %s434_s18, 4  ;;  %s51_s21 = sshll.u32 %s435_s20, 4  ;;  %s33_s19 = int_to_ptr.vmem [resolvable:$true] %s32_s19  ;;  %s476_s21 = int_to_ptr.vmem [resolvable:$true] %s51_s21 }
   0x5   :  { %s294_s24 = scalar_lea.hbm %s568_s1, 16 }
   0x6   :  { %p295_p0 = scmp.ne.s32.totalorder %s568_s1, %s294_s24  ;;  %p298_p1 = scmp.lt.u32.totalorder %s294_s24, %s568_s1 }
   0x8   :  { %p300_p2 = pnand %p298_p1, %p295_p0 }
   0xa   :  { %303 = shalt.err (!%p300_p2)
}
   0xb   :  { %s304_s29 = scalar_lea.vmem %s33_s19, 16  ;;  %s308_s30 = scalar_lea.vmem %s33_s19, 32 }
   0xc   :  { %p305_p3 = scmp.ne.s32.totalorder %s33_s19, %s304_s29  ;;  %p309_p4 = scmp.lt.s32.totalorder %s33_s19, %s33_s19 }
   0xd   :  { %p310_p5 = scmp.lt.s32.totalorder %s308_s30, %s304_s29 }
   0xf   :  { %p311_p6 = por %p310_p5, %p309_p4 }
  0x11   :  { %p312_p7 = pnand %p311_p6, %p305_p3 }
  0x13   :  { %315 = shalt.err (!%p312_p7)
}
  0x14   :  { %35 = dma.hbm_to_vmem [thread:$0]  %s568_s1, 16, %s33_s19, [#allocation7]  }
  0x15   :  { %s316_s10 = scalar_lea.hbm %s570_s3, 256 }
  0x16   :  { %p317_p8 = scmp.ne.s32.totalorder %s570_s3, %s316_s10  ;;  %p320_p9 = scmp.lt.u32.totalorder %s316_s10, %s570_s3 }
  0x18   :  { %p322_p10 = pnand %p320_p9, %p317_p8 }
  0x1a   :  { %325 = shalt.err (!%p322_p10)
}
  0x1b   :  { %s326_s15 = scalar_lea.vmem %s476_s21, 256  ;;  %p331_p12 = scmp.lt.s32.totalorder %s476_s21, %s476_s21 }
  0x1c   :  { %p327_p11 = scmp.ne.s32.totalorder %s476_s21, %s326_s15  ;;  %p332_p13 = scmp.lt.s32.totalorder %s326_s15, %s326_s15 }
  0x1e   :  { %p333_p0 = por %p332_p13, %p331_p12 }
  0x20   :  { %p334_p1 = pnand %p333_p0, %p327_p11 }
  0x22   :  { %337 = shalt.err (!%p334_p1)
}
  0x23   :  { %s436_s1 = smov 64   ;;  %s437_s16 = smov 4  }
  0x24   :  { %57 = dma.hbm_to_vmem [thread:$0]  %s570_s3, 256, %s476_s21, [#allocation10], %s436_s1, %s436_s1, %s437_s16  }
  0x25   :  { %s438_s19 = smov [#allocation3]   ;;  %s338_s24 = scalar_lea.hbm %s567_s0, 256 }
  0x26   :  { %s19_s20 = sshll.u32 %s438_s19, 4  ;;  %p339_p2 = scmp.ne.s32.totalorder %s567_s0, %s338_s24  ;;  %s20_s20 = int_to_ptr.vmem [resolvable:$true] %s19_s20 }
  0x27   :  { %p342_p3 = scmp.lt.u32.totalorder %s338_s24, %s567_s0 }
  0x29   :  { %p344_p4 = pnand %p342_p3, %p339_p2 }
  0x2b   :  { %347 = shalt.err (!%p344_p4)
}
  0x2c   :  { %s348_s29 = scalar_lea.vmem %s20_s20, 256  ;;  %p353_p6 = scmp.lt.s32.totalorder %s20_s20, %s20_s20 }
  0x2d   :  { %p349_p5 = scmp.ne.s32.totalorder %s20_s20, %s348_s29  ;;  %p354_p7 = scmp.lt.s32.totalorder %s348_s29, %s348_s29 }
  0x2f   :  { %p355_p8 = por %p354_p7, %p353_p6 }
  0x31   :  { %p356_p9 = pnand %p355_p8, %p349_p5 }
  0x33   :  { %359 = shalt.err (!%p356_p9)
}
  0x34   :  { %s439_s3 = smov 128   ;;  %s440_s21 = smov 8  }
  0x35   :  { %25 = dma.hbm_to_vmem [thread:$0]  %s567_s0, 256, %s20_s20, [#allocation4], %s439_s3, %s439_s3, %s440_s21  }
  0x36   :  { %s441_s7 = smov [#allocation8]   ;;  %s442_s9 = smov [#allocation11]  }
  0x37   :  { %s42_s8 = sshll.u32 %s441_s7, 4  ;;  %s64_s10 = sshll.u32 %s442_s9, 4  ;;  %s43_s8 = int_to_ptr.vmem [resolvable:$true] %s42_s8  ;;  %s65_s10 = int_to_ptr.vmem [resolvable:$true] %s64_s10 }
  0x38   :  { %s360_s13 = scalar_lea.hbm %s569_s2, 16 }
  0x39   :  { %p361_p10 = scmp.ne.s32.totalorder %s569_s2, %s360_s13  ;;  %p364_p11 = scmp.lt.u32.totalorder %s360_s13, %s569_s2 }
  0x3b   :  { %p366_p12 = pnand %p364_p11, %p361_p10 }
  0x3d   :  { %369 = shalt.err (!%p366_p12)
}
  0x3e   :  { %s370_s0 = scalar_lea.vmem %s43_s8, 16  ;;  %s374_s19 = scalar_lea.vmem %s43_s8, 32 }
  0x3f   :  { %p371_p13 = scmp.ne.s32.totalorder %s43_s8, %s370_s0  ;;  %p375_p0 = scmp.lt.s32.totalorder %s43_s8, %s43_s8 }
  0x40   :  { %p376_p1 = scmp.lt.s32.totalorder %s374_s19, %s370_s0 }
  0x42   :  { %p377_p2 = por %p376_p1, %p375_p0 }
  0x44   :  { %p378_p3 = pnand %p377_p2, %p371_p13 }
  0x46   :  { %381 = shalt.err (!%p378_p3)
}
  0x47   :  { %45 = dma.hbm_to_vmem [thread:$0]  %s569_s2, 16, %s43_s8, [#allocation7]  }
  0x48   :  { %s382_s25 = scalar_lea.hbm %s571_s4, 16 }
  0x49   :  { %p383_p4 = scmp.ne.s32.totalorder %s571_s4, %s382_s25  ;;  %p386_p5 = scmp.lt.u32.totalorder %s382_s25, %s571_s4 }
  0x4b   :  { %p388_p6 = pnand %p386_p5, %p383_p4 }
  0x4d   :  { %391 = shalt.err (!%p388_p6)
}
  0x4e   :  { %s392_s3 = scalar_lea.vmem %s65_s10, 16  ;;  %s396_s21 = scalar_lea.vmem %s65_s10, 32 }
  0x4f   :  { %p393_p7 = scmp.ne.s32.totalorder %s65_s10, %s392_s3  ;;  %p397_p8 = scmp.lt.s32.totalorder %s65_s10, %s65_s10 }
  0x50   :  { %p398_p9 = scmp.lt.s32.totalorder %s396_s21, %s392_s3 }
  0x52   :  { %p399_p10 = por %p398_p9, %p397_p8 }
  0x54   :  { %p400_p11 = pnand %p399_p10, %p393_p7 }
  0x56   :  { %403 = shalt.err (!%p400_p11)
}
  0x57   :  { %67 = dma.hbm_to_vmem [thread:$0]  %s571_s4, 16, %s65_s10, [#allocation10]  }
  0x58   :  { %426 = dma.done.wait [#allocation4], 256  }
  0x59   :  { %427 = vsyncadd [#allocation4], 4294967040 }
  0x5a   :  { %428 = dma.done.wait [#allocation7], 32  }
  0x5b   :  { %429 = vsyncadd [#allocation7], 4294967264 }
  0x5c   :  { %430 = dma.done.wait [#allocation10], 272  }
  0x5d   :  { %431 = vsyncadd [#allocation10], 4294967024  ;;  %vm90_vm0 = vcmask 261120   ;;  %v88_v0 = vld [vmem:[#allocation3] sm:$0xff]  ;;  %v89_v1 = vld [vmem:[#allocation3 + $0x8] sm:$0xff]  ;;  %v443_v15 = vmov 0.0  }
  0x5e   :  { %v91_v2 = vsel %vm90_vm0, %v88_v0, 0.0  ;;  %v94_v3 = vsel %vm90_vm0, %v89_v1, 0.0  ;;  %v284_v14 = vld [vmem:[#allocation9] sm:$0xff]   ;;  %264 = vmatprep.subr.bf16.mxu0 %v443_v15  ;;  %v285_v16 = vld [vmem:[#allocation9 + $0x8] sm:$0xff]   ;;  %vm444_vm1 = vmmov 0   ;;  %s445_s4 = smov [#allocation12]  }
  0x5f   :  { %92 = vadd.xlane.f32.xlu0 %v91_v2  ;;  %265 = vmatpush3.bf16.msra.mxu0 %v284_v14  ;;  %v246_v25 = vld [vmem:[#allocation6] ss:$0 sm:$0xff]  ;;  %v247_v29 = vld [vmem:[#allocation8] ss:$0 sm:$0xff]  ;;  %v248_v35 = vld [vmem:[#allocation11] ss:$0 sm:$0xff] }
  0x60   :  { %268 = vmatprep.mubr.msk.bf16.mxu0 %vm444_vm1, %v443_v15  ;;  %266 = vmatprep.subr.bf16.mxu0 %v443_v15  ;;  %s232_s6 = sshll.u32 %s445_s4, 4  ;;  %s233_s6 = int_to_ptr.vmem [resolvable:$true] %s232_s6 }
  0x61   :  { %s404_s7 = scalar_lea.vmem %s233_s6, 128  ;;  %p409_p13 = scmp.lt.s32.totalorder %s233_s6, %s233_s6 }
  0x62   :  { %p405_p12 = scmp.ne.s32.totalorder %s233_s6, %s404_s7  ;;  %p410_p0 = scmp.lt.s32.totalorder %s404_s7, %s404_s7 }
  0x63   :  { %95 = vadd.xlane.f32.xlu0 %v94_v3  ;;  %267 = vmatpush3.bf16.msra.mxu0 %v285_v16 }
  0x64   :  { %p411_p1 = por %p410_p0, %p409_p13 }
  0x66   :  { %p412_p2 = pnand %p411_p1, %p405_p12 }
  0xec   :  { %v93_v4 = vpop.xlane.xlu0 %92 }
  0xed   :  { %v98_v5 = vmul.f32 0.03125, %v93_v4 }
  0xef   :  { %v100_v6 = vsub.f32 %v88_v0, %v98_v5 }
  0xf0   :  { %v96_v7 = vpop.xlane.xlu0 %95 }
  0xf1   :  { %v99_v8 = vmul.f32 0.03125, %v96_v7  ;;  %v102_v9 = vmul.f32 %v100_v6, %v100_v6 }
  0xf3   :  { %v101_v10 = vsub.f32 %v89_v1, %v99_v8  ;;  %v104_v11 = vsel %vm90_vm0, %v102_v9, 0.0 }
  0xf4   :  { %105 = vadd.xlane.f32.xlu1 %v104_v11 }
  0xf5   :  { %v103_v12 = vmul.f32 %v101_v10, %v101_v10 }
  0xf7   :  { %v107_v13 = vsel %vm90_vm0, %v103_v12, 0.0 }
  0xf8   :  { %108 = vadd.xlane.f32.xlu1 %v107_v13 }
 0x181   :  { %v106_v17 = vpop.xlane.xlu1 %105 }
 0x182   :  { %v110_v18 = vmul.f32 0.03125, %v106_v17 }
 0x184   :  { %v112_v19 = vadd.f32 1e-05, %v110_v18 }
 0x185   :  { %v109_v20 = vpop.xlane.xlu1 %108 }
 0x186   :  { %286 = vrsqrt.f32 %v112_v19  ;;  %v111_v21 = vmul.f32 0.03125, %v109_v20 }
 0x188   :  { %v113_v22 = vadd.f32 1e-05, %v111_v21 }
 0x18a   :  { %288 = vrsqrt.f32 %v113_v22 }
 0x190   :  { %v287_v23 = vpop.eup %286 }
 0x191   :  { %v116_v24 = vmul.f32 %v287_v23, %v100_v6 }
 0x193   :  { %v125_v27 = vmul.f32 %v246_v25, %v116_v24 }
 0x194   :  { %v289_v26 = vpop.eup %288 }
 0x195   :  { %v117_v28 = vmul.f32 %v289_v26, %v101_v10  ;;  %v134_v31 = vadd.f32 %v247_v29, %v125_v27 }
 0x197   :  { %v126_v30 = vmul.f32 %v246_v25, %v117_v28 }
 0x199   :  { %v135_v32 = vadd.f32 %v247_v29, %v126_v30 }
 0x19b   :  { %v136_v33 = vpack.c.bf16 %v135_v32, %v134_v31 }
 0x19d   :  { %137 = vst.msk [vmem:[#allocation2] sm:$0xff] %vm90_vm0, %v136_v33 }
 0x1a4   :  { %v138_v34 = vld [vmem:[#allocation2] sm:$0xff] }
 0x1a5   :  { %269 = vmatmul.mubr.msk.bf16.vlgmr.msra.gmra.mrb[0].mxu0 %vm90_vm0, %v138_v34 }
 0x278   :  { %v200_v36 = vpop.f32.mrb[0].mxu0 }
 0x279   :  { %v201_v37 = vadd.f32 %v248_v35, %v200_v36  ;;  %v270_v38 = vpop.f32.mrb[1].mxu0 }
 0x27a   :  { %v203_v39 = vpop.f32.mrb[2].mxu0 }
 0x27b   :  { %v209_v40 = vmul.f32 0.70710677, %v201_v37  ;;  %v204_v41 = vadd.f32 %v248_v35, %v203_v39  ;;  %v271_v42 = vpop.f32.mrb[3].mxu0  ;;  %v207_v47 = vmul.f32 0.5, %v201_v37 }
 0x27d   :  { %290 = verf.f32 %v209_v40  ;;  %v210_v43 = vmul.f32 0.70710677, %v204_v41  ;;  %v208_v48 = vmul.f32 0.5, %v204_v41 }
 0x27f   :  { %292 = verf.f32 %v210_v43 }
 0x287   :  { %v291_v44 = vpop.eup %290 }
 0x288   :  { %v213_v45 = vadd.f32 1.0, %v291_v44 }
 0x289   :  { %v293_v46 = vpop.eup %292 }
 0x28a   :  { %v214_v49 = vadd.f32 1.0, %v293_v46  ;;  %v215_v50 = vmul.f32 %v213_v45, %v207_v47 }
 0x28c   :  { %v216_v51 = vmul.f32 %v214_v49, %v208_v48 }
 0x28e   :  { %v259_v52 = vpack.c.bf16 %v216_v51, %v215_v50 }
 0x290   :  { %260 = vst [vmem:[#allocation12] sm:$0xff] %v259_v52  }
 0x291   :  { %415 = shalt.err (!%p412_p2)
}
 0x292   :  { %s416_s10 = scalar_lea.hbm %s572_s5, 128 }
 0x293   :  { %p417_p3 = scmp.ne.s32.totalorder %s572_s5, %s416_s10  ;;  %p420_p4 = scmp.lt.u32.totalorder %s416_s10, %s572_s5 }
 0x295   :  { %p422_p5 = pnand %p420_p4, %p417_p3 }
 0x297   :  { %425 = shalt.err (!%p422_p5)
}
 0x298   :  { %238 = dma.vmem_to_hbm [thread:$0]  %s233_s6, 128, %s572_s5, [#allocation5], %s436_s1, %s436_s1, %s437_s16  }
 0x299   :  { %432 = dma.done.wait [#allocation5], 128  }
 0x29a   :  { %433 = vsyncadd [#allocation5], 4294967168 }
 0x29b   :  { %242 = vsyncpa [#allocation4], 1 }
 0x29c   :  { %243 = vsyncpa [#allocation7], 1 }
 0x29d   :  { %244 = vsyncpa [#allocation10], 1 }
 0x29e   :  { %245 = vsyncpa [#allocation5], 1 }

// kernel: lion_block.9
= control target key start
LH: loop header
LB: loop body
LE: loop exit
PB: predicated region body
PF: predicated region fallthrough
CT: control target
= control target key end

     0   :  { %9 = vsyncpa [#allocation4], 0  ;;  %s537_s0 = inlined_call_operand.hbm [shape: bf16[16,128], index: 0, kind: input, shape index: {}]   ;;  %s538_s1 = inlined_call_operand.hbm [shape: bf16[128,32], index: 1, kind: input, shape index: {}]   ;;  %s539_s2 = inlined_call_operand.hbm [shape: f32[1,32], index: 2, kind: input, shape index: {}]   ;;  %s540_s3 = inlined_call_operand.hbm [shape: f32[16,32], index: 3, kind: input, shape index: {}]   ;;  %s541_s4 = inlined_call_operand.hbm [shape: f32[16,32], index: 4, kind: output, shape index: {}]  }
   0x1   :  { %10 = vsyncpa [#allocation7], 0 }
   0x2   :  { %11 = vsyncpa [#allocation10], 0 }
   0x3   :  { %12 = vsyncpa [#allocation5], 0  ;;  %s415_s15 = smov [#allocation6]   ;;  %s416_s17 = smov [#allocation3]  }
   0x4   :  { %s30_s16 = sshll.u32 %s415_s15, 4  ;;  %s18_s18 = sshll.u32 %s416_s17, 4  ;;  %s31_s16 = int_to_ptr.vmem [resolvable:$true] %s30_s16  ;;  %s451_s18 = int_to_ptr.vmem [resolvable:$true] %s18_s18 }
   0x5   :  { %s297_s21 = scalar_lea.hbm %s538_s1, 1024 }
   0x6   :  { %p298_p0 = scmp.ne.s32.totalorder %s538_s1, %s297_s21  ;;  %p301_p1 = scmp.lt.u32.totalorder %s297_s21, %s538_s1 }
   0x8   :  { %p303_p2 = pnand %p301_p1, %p298_p0 }
   0xa   :  { %306 = shalt.err (!%p303_p2)
}
   0xb   :  { %s307_s26 = scalar_lea.vmem %s31_s16, 1024  ;;  %p312_p4 = scmp.lt.s32.totalorder %s31_s16, %s31_s16 }
   0xc   :  { %p308_p3 = scmp.ne.s32.totalorder %s31_s16, %s307_s26  ;;  %p313_p5 = scmp.lt.s32.totalorder %s307_s26, %s307_s26 }
   0xe   :  { %p314_p6 = por %p313_p5, %p312_p4 }
  0x10   :  { %p315_p7 = pnand %p314_p6, %p308_p3 }
  0x12   :  { %318 = shalt.err (!%p315_p7)
}
  0x13   :  { %s417_s27 = smov 64   ;;  %s418_s28 = smov 4  }
  0x14   :  { %36 = dma.hbm_to_vmem [thread:$0]  %s538_s1, 1024, %s31_s16, [#allocation7], %s417_s27, %s417_s27, %s418_s28  }
  0x15   :  { %s319_s7 = scalar_lea.hbm %s537_s0, 128 }
  0x16   :  { %p320_p8 = scmp.ne.s32.totalorder %s537_s0, %s319_s7  ;;  %p323_p9 = scmp.lt.u32.totalorder %s319_s7, %s537_s0 }
  0x18   :  { %p325_p10 = pnand %p323_p9, %p320_p8 }
  0x1a   :  { %328 = shalt.err (!%p325_p10)
}
  0x1b   :  { %s329_s12 = scalar_lea.vmem %s451_s18, 128  ;;  %p334_p12 = scmp.lt.s32.totalorder %s451_s18, %s451_s18 }
  0x1c   :  { %p330_p11 = scmp.ne.s32.totalorder %s451_s18, %s329_s12  ;;  %p335_p13 = scmp.lt.s32.totalorder %s329_s12, %s329_s12 }
  0x1e   :  { %p336_p0 = por %p335_p13, %p334_p12 }
  0x20   :  { %p337_p1 = pnand %p336_p0, %p330_p11 }
  0x22   :  { %340 = shalt.err (!%p337_p1)
}
  0x23   :  { %24 = dma.hbm_to_vmem [thread:$0]  %s537_s0, 128, %s451_s18, [#allocation4], %s417_s27, %s417_s27, %s418_s28  }
  0x24   :  { %s419_s14 = smov [#allocation8]   ;;  %s420_s16 = smov [#allocation9]  }
  0x25   :  { %s43_s15 = sshll.u32 %s419_s14, 4  ;;  %s52_s17 = sshll.u32 %s420_s16, 4  ;;  %s44_s15 = int_to_ptr.vmem [resolvable:$true] %s43_s15  ;;  %s482_s17 = int_to_ptr.vmem [resolvable:$true] %s52_s17 }
  0x26   :  { %s341_s21 = scalar_lea.hbm %s539_s2, 16 }
  0x27   :  { %p342_p2 = scmp.ne.s32.totalorder %s539_s2, %s341_s21  ;;  %p345_p3 = scmp.lt.u32.totalorder %s341_s21, %s539_s2 }
  0x29   :  { %p347_p4 = pnand %p345_p3, %p342_p2 }
  0x2b   :  { %350 = shalt.err (!%p347_p4)
}
  0x2c   :  { %s351_s0 = scalar_lea.vmem %s44_s15, 16  ;;  %s355_s18 = scalar_lea.vmem %s44_s15, 32 }
  0x2d   :  { %p352_p5 = scmp.ne.s32.totalorder %s44_s15, %s351_s0  ;;  %p356_p6 = scmp.lt.s32.totalorder %s44_s15, %s44_s15 }
  0x2e   :  { %p357_p7 = scmp.lt.s32.totalorder %s355_s18, %s351_s0 }
  0x30   :  { %p358_p8 = por %p357_p7, %p356_p6 }
  0x32   :  { %p359_p9 = pnand %p358_p8, %p352_p5 }
  0x34   :  { %362 = shalt.err (!%p359_p9)
}
  0x35   :  { %46 = dma.hbm_to_vmem [thread:$0]  %s539_s2, 16, %s44_s15, [#allocation7]  }
  0x36   :  { %s363_s30 = scalar_lea.hbm %s540_s3, 256 }
  0x37   :  { %p364_p10 = scmp.ne.s32.totalorder %s540_s3, %s363_s30  ;;  %p367_p11 = scmp.lt.u32.totalorder %s363_s30, %s540_s3 }
  0x39   :  { %p369_p12 = pnand %p367_p11, %p364_p10 }
  0x3b   :  { %372 = shalt.err (!%p369_p12)
}
  0x3c   :  { %s373_s9 = scalar_lea.vmem %s482_s17, 256  ;;  %p378_p0 = scmp.lt.s32.totalorder %s482_s17, %s482_s17 }
  0x3d   :  { %p374_p13 = scmp.ne.s32.totalorder %s482_s17, %s373_s9  ;;  %p379_p1 = scmp.lt.s32.totalorder %s373_s9, %s373_s9 }
  0x3f   :  { %p380_p2 = por %p379_p1, %p378_p0 }
  0x41   :  { %p381_p3 = pnand %p380_p2, %p374_p13 }
  0x43   :  { %384 = shalt.err (!%p381_p3)
}
  0x44   :  { %s421_s2 = smov 128   ;;  %s422_s10 = smov 8  }
  0x45   :  { %58 = dma.hbm_to_vmem [thread:$0]  %s540_s3, 256, %s482_s17, [#allocation10], %s421_s2, %s421_s2, %s422_s10  }
  0x46   :  { %407 = dma.done.wait [#allocation4], 128  }
  0x47   :  { %408 = vsyncadd [#allocation4], 4294967168 }
  0x48   :  { %409 = dma.done.wait [#allocation7], 1040  }
  0x49   :  { %410 = vsyncadd [#allocation7], 4294966256 }
  0x4a   :  { %411 = dma.done.wait [#allocation10], 256  }
  0x4b   :  { %412 = vsyncadd [#allocation10], 4294967040  ;;  %vm76_vm0 = vcmask 261120   ;;  %v423_v0 = vmov 0.0   ;;  %vm424_vm1 = vmmov 0   ;;  %v288_v1 = vld [vmem:[#allocation6] sm:$0xff]  }
  0x4c   :  { %257 = vmatprep.subr.bf16.mxu0 %v423_v0  ;;  %273 = vmatprep.mubr.msk.bf16.mxu0 %vm424_vm1, %v423_v0  ;;  %77 = vst.msk [vmem:[#allocation2] sm:$0xff] %vm76_vm0, %v423_v0  ;;  %78 = vst.msk [vmem:[#allocation2 + $0x8] sm:$0xff] %vm76_vm0, %v423_v0  ;;  %v289_v2 = vld [vmem:[#allocation6 + $0x8] sm:$0xff]   ;;  %v290_v3 = vld [vmem:[#allocation6 + $0x10] sm:$0xff]   ;;  %s425_s3 = smov [#allocation11]  }
  0x4d   :  { %258 = vmatpush3.bf16.msra.mxu0 %v288_v1  ;;  %v291_v4 = vld [vmem:[#allocation6 + $0x18] sm:$0xff]   ;;  %v292_v5 = vld [vmem:[#allocation6 + $0x20] sm:$0xff]   ;;  %v293_v6 = vld [vmem:[#allocation6 + $0x28] sm:$0xff]   ;;  %s224_s1 = sshll.u32 %s425_s3, 4  ;;  %s225_s1 = int_to_ptr.vmem [resolvable:$true] %s224_s1 }
  0x4e   :  { %259 = vmatprep.subr.bf16.mxu0 %v423_v0  ;;  %v294_v7 = vld [vmem:[#allocation6 + $0x30] sm:$0xff]   ;;  %v295_v8 = vld [vmem:[#allocation6 + $0x38] sm:$0xff]   ;;  %v247_v18 = vld [vmem:[#allocation8] ss:$0 sm:$0xff]  ;;  %s385_s13 = scalar_lea.vmem %s225_s1, 256  ;;  %p390_p5 = scmp.lt.s32.totalorder %s225_s1, %s225_s1 }
  0x4f   :  { %v296_v9 = vld [vmem:[#allocation3] sm:$0xff]   ;;  %v213_v20 = vld [vmem:[#allocation9] sm:$0xff]  ;;  %v214_v23 = vld [vmem:[#allocation9 + $0x8] sm:$0xff]  ;;  %p386_p4 = scmp.ne.s32.totalorder %s225_s1, %s385_s13  ;;  %p391_p6 = scmp.lt.s32.totalorder %s385_s13, %s385_s13 }
  0x51   :  { %260 = vmatpush3.bf16.msra.mxu0 %v289_v2  ;;  %p392_p7 = por %p391_p6, %p390_p5 }
  0x52   :  { %261 = vmatprep.subr.bf16.mxu0 %v423_v0 }
  0x53   :  { %v79_v10 = vld [vmem:[#allocation2] sm:$0xff]  ;;  %v80_v12 = vld [vmem:[#allocation2 + $0x8] sm:$0xff]  ;;  %p393_p8 = pnand %p392_p7, %p386_p4 }
  0x55   :  { %262 = vmatpush3.bf16.msra.mxu0 %v290_v3 }
  0x56   :  { %263 = vmatprep.subr.bf16.mxu0 %v423_v0 }
  0x59   :  { %264 = vmatpush3.bf16.msra.mxu0 %v291_v4 }
  0x5a   :  { %265 = vmatprep.subr.bf16.mxu0 %v423_v0 }
  0x5d   :  { %266 = vmatpush3.bf16.msra.mxu0 %v292_v5 }
  0x5e   :  { %267 = vmatprep.subr.bf16.mxu0 %v423_v0 }
  0x61   :  { %268 = vmatpush3.bf16.msra.mxu0 %v293_v6 }
  0x62   :  { %269 = vmatprep.subr.bf16.mxu0 %v423_v0 }
  0x65   :  { %270 = vmatpush3.bf16.msra.mxu0 %v294_v7 }
  0x66   :  { %271 = vmatprep.subr.bf16.mxu0 %v423_v0 }
  0x69   :  { %272 = vmatpush3.bf16.msra.mxu0 %v295_v8 }
  0x6c   :  { %274 = vmatmul.mubr.bf16.vlgmr.msra.gmra.mrb[0].mxu0 %v296_v9 }
 0x13f   :  { %v187_v11 = vpop.f32.mrb[0].mxu0 }
 0x140   :  { %v194_v13 = vadd.f32 %v187_v11, %v79_v10  ;;  %v275_v14 = vpop.f32.mrb[1].mxu0 }
 0x141   :  { %v190_v15 = vpop.f32.mrb[2].mxu0 }
 0x142   :  { %197 = vst.msk [vmem:[#allocation2] sm:$0xff] %vm76_vm0, %v194_v13  ;;  %v195_v16 = vadd.f32 %v190_v15, %v80_v12  ;;  %v276_v17 = vpop.f32.mrb[3].mxu0 }
 0x144   :  { %198 = vst.msk [vmem:[#allocation2 + $0x8] sm:$0xff] %vm76_vm0, %v195_v16 }
 0x149   :  { %v202_v19 = vld [vmem:[#allocation2] sm:$0xff] }
 0x14a   :  { %v211_v21 = vadd.f32 %v247_v18, %v202_v19 }
 0x14b   :  { %v203_v22 = vld [vmem:[#allocation2 + $0x8] sm:$0xff] }
 0x14c   :  { %v212_v24 = vadd.f32 %v247_v18, %v203_v22  ;;  %v215_v25 = vadd.f32 %v213_v20, %v211_v21 }
 0x14e   :  { %v216_v26 = vadd.f32 %v214_v23, %v212_v24  ;;  %217 = vst.msk [vmem:[#allocation11] sm:$0xff] %vm76_vm0, %v215_v25 }
 0x150   :  { %218 = vst.msk [vmem:[#allocation11 + $0x8] sm:$0xff] %vm76_vm0, %v216_v26 }
 0x151   :  { %396 = shalt.err (!%p393_p8)
}
 0x152   :  { %s397_s16 = scalar_lea.hbm %s541_s4, 256 }
 0x153   :  { %p398_p9 = scmp.ne.s32.totalorder %s541_s4, %s397_s16  ;;  %p401_p10 = scmp.lt.u32.totalorder %s397_s16, %s541_s4 }
 0x155   :  { %p403_p11 = pnand %p401_p10, %p398_p9 }
 0x157   :  { %406 = shalt.err (!%p403_p11)
}
 0x158   :  { %230 = dma.vmem_to_hbm [thread:$0]  %s225_s1, 256, %s541_s4, [#allocation5], %s421_s2, %s421_s2, %s422_s10  }
 0x159   :  { %413 = dma.done.wait [#allocation5], 256  }
 0x15a   :  { %414 = vsyncadd [#allocation5], 4294967040 }
 0x15b   :  { %234 = vsyncpa [#allocation4], 1 }
 0x15c   :  { %235 = vsyncpa [#allocation7], 1 }
 0x15d   :  { %236 = vsyncpa [#allocation10], 1 }
 0x15e   :  { %237 = vsyncpa [#allocation5], 1 }

</bundles_post_ra>
